<compile_context>
chip_gen: v5e
topology: v5e:2x2
jax: 0.10.0
libtpu: 0.0.40
codegen_flags: <defaults>
</compile_context>

<pallas_src>
import numpy as np

import jax
import jax.numpy as jnp
from jax import lax
from jax.experimental import pallas as pl
from jax.experimental.pallas import tpu as pltpu


# ----------------------------------------------------------------------------
# One-time (init) packing: per-tap weights + 0/1 im2col gather matrices
# ----------------------------------------------------------------------------
def _tap_select(h_in, w_in, kh, kw, stride, pad):
    """S[t] (M_out, M_in) 0/1: S[t] @ act gathers, for kernel tap t=(ih,iw),
    the strided / zero-padded input row of every output position.
    Activation rows are spatial positions (h-major), columns are channels."""
    h_out = (h_in + 2 * pad - kh) // stride + 1
    w_out = (w_in + 2 * pad - kw) // stride + 1
    s = np.zeros((kh * kw, h_out * w_out, h_in * w_in), np.float32)
    for ih in range(kh):
        for iw in range(kw):
            t = ih * kw + iw
            for ho in range(h_out):
                hi = ho * stride + ih - pad
                if not 0 <= hi < h_in:
                    continue
                for wo in range(w_out):
                    wi = wo * stride + iw - pad
                    if 0 <= wi < w_in:
                        s[t, ho * w_out + wo, hi * w_in + wi] = 1.0
    return jnp.asarray(s, jnp.bfloat16)          # 0/1 is exact in bf16


def pack_params(params, w_last, height, width):
    """Done ONCE at init (outside the jitted forward):
       - layer 1 weights -> (KH*KW*Cin, Cout) bf16, rows ordered (kh, kw, cin)
       - layers 2..L     -> per-tap weights (T, Cin, Cout) bf16 + gather S
       - biases          -> (1, Cout) f32
    Returns a flat list [w1, b1, S2, w2, b2, ..., S_last, w_last]."""
    packed = []
    (w1, b1) = params[0]
    cout1, cin1, k1h, k1w = w1.shape
    packed.append(jnp.asarray(w1).transpose(2, 3, 1, 0)
                  .reshape(k1h * k1w * cin1, cout1).astype(jnp.bfloat16))
    packed.append(jnp.asarray(b1).reshape(1, cout1).astype(jnp.float32))

    h, w = height // 2, width // 2                      # spatial after layer 1
    for (wl, bl) in params[1:]:                         # conv k4 s2 p1 layers
        cout, cin, kh, kw = wl.shape
        packed.append(_tap_select(h, w, kh, kw, 2, 1))  # (T, M_out, M_in)
        packed.append(jnp.asarray(wl).transpose(2, 3, 1, 0)
                      .reshape(kh * kw, cin, cout).astype(jnp.bfloat16))
        packed.append(jnp.asarray(bl).reshape(1, cout).astype(jnp.float32))
        h, w = h // 2, w // 2

    cout, cin, kh, kw = w_last.shape                    # final conv k3 s1 p1
    packed.append(_tap_select(h, w, kh, kw, 1, 1))
    packed.append(jnp.asarray(w_last).transpose(2, 3, 1, 0)
                  .reshape(kh * kw, cin, cout).astype(jnp.bfloat16))
    return packed


# ----------------------------------------------------------------------------
# Layer-1 im2col (one fused XLA op on the tiny network input, inside jit)
# ----------------------------------------------------------------------------
def _im2col_k4s2p1(x):
    """(N, C, H, W) -> (N, (H//2)*(W//2), 4*4*C) patches for a k=4,s=2,p=1 conv.
    Rows ordered (ho, wo); columns ordered (kh, kw, cin) to match pack_params."""
    n, c, h, w = x.shape
    ho, wo = h // 2, w // 2
    xp = jnp.pad(x, ((0, 0), (0, 0), (1, 1), (1, 1)))
    taps = [xp[:, :, ih:ih + 2 * ho:2, iw:iw + 2 * wo:2]
            for ih in range(4) for iw in range(4)]
    p = jnp.stack(taps, axis=0)                 # (16, N, C, Ho, Wo)
    p = p.transpose(1, 3, 4, 0, 2)              # (N, Ho, Wo, 16, C)
    return p.reshape(n, ho * wo, 16 * c)


# ----------------------------------------------------------------------------
# Fused Pallas kernel: all conv layers of one image per grid step
# ----------------------------------------------------------------------------
def _make_kernel(num_main_layers):
    def kernel(*refs):
        o_ref = refs[-1]

        def lrelu(v):                                   # f32 epilogue
            return jnp.where(v >= 0.0, v, 0.01 * v)

        def conv_taps(act_bf16, s_ref, w_ref):
            """sum_t (S[t] @ act) @ W[t]  -- all bf16 MXU matmuls, f32 accum."""
            num_taps = s_ref.shape[0]
            acc = jnp.zeros((s_ref.shape[1], w_ref.shape[2]), jnp.float32)
            for t in range(num_taps):                   # static unroll
                g = jnp.dot(s_ref[t], act_bf16,
                            preferred_element_type=jnp.float32)
                acc = acc + jnp.dot(g.astype(jnp.bfloat16), w_ref[t],
                                    preferred_element_type=jnp.float32)
            return acc

        # ---- layer 1: pre-built im2col patches (per-image block) @ weights
        p1_ref, w1_ref, b1_ref = refs[0], refs[1], refs[2]
        h = jnp.dot(p1_ref[0], w1_ref[...], preferred_element_type=jnp.float32)
        h = lrelu(h + b1_ref[...]).astype(jnp.bfloat16)

        # ---- layers 2..L: conv k4 s2 p1 + LeakyReLU, VMEM-resident
        idx = 3
        for _ in range(num_main_layers - 1):
            s_ref, w_ref, b_ref = refs[idx], refs[idx + 1], refs[idx + 2]
            idx += 3
            h = lrelu(conv_taps(h, s_ref, w_ref) + b_ref[...]).astype(jnp.bfloat16)

        # ---- final conv k3 s1 p1: no bias, no activation
        s_ref, w_ref = refs[idx], refs[idx + 1]
        o_ref[0] = conv_taps(h, s_ref, w_ref)           # (Hf*Wf, 1) f32
    return kernel


def _shared_spec(arr):
    zero = (0,) * arr.ndim
    return pl.BlockSpec(arr.shape, lambda n, zero=zero: zero)


def _fused_forward(x, packed):
    n, _, height, width = x.shape
    num_main = (len(packed) - 1) // 3                   # 2 + 3*(L-1) + 2 inputs
    hf, wf = height >> num_main, width >> num_main
    m_out = hf * wf

    p1 = _im2col_k4s2p1(x).astype(jnp.bfloat16)         # (N, M1, K1)
    m1, k1 = p1.shape[1], p1.shape[2]

    in_specs = [pl.BlockSpec((1, m1, k1), lambda i: (i, 0, 0))]
    in_specs += [_shared_spec(a) for a in packed]

    out = pl.pallas_call(
        _make_kernel(num_main),
        out_shape=jax.ShapeDtypeStruct((n, m_out, 1), jnp.float32),
        grid_spec=pltpu.PrefetchScalarGridSpec(
            num_scalar_prefetch=0,
            grid=(n,),
            in_specs=in_specs,
            out_specs=pl.BlockSpec((1, m_out, 1), lambda i: (i, 0, 0)),
        ),
        compiler_params=pltpu.CompilerParams(
            dimension_semantics=("parallel",)),          # 2 TCs on v7x
    )(p1, *packed)

    return out.reshape(n, 1, hf, wf)                     # NCHW, Cout=1


perturbation_discriminator = jax.jit(_fused_forward)


# ----------------------------------------------------------------------------
# Deterministic synthetic parameters (PyTorch Conv2d weight shapes)
# ----------------------------------------------------------------------------
def init_params(key, conv_dim=8, repeat_num=3):
    params = []
    cin, cout = 3, conv_dim
    for _ in range(repeat_num):
        key, kw_, kb_ = jax.random.split(key, 3)
        w = jax.random.normal(kw_, (cout, cin, 4, 4), jnp.float32) * 0.05
        b = jax.random.normal(kb_, (cout,), jnp.float32) * 0.05
        params.append((w, b))
        cin, cout = cout, cout * 2
    key, kw_ = jax.random.split(key)
    w_last = jax.random.normal(kw_, (1, cin, 3, 3), jnp.float32) * 0.05  # bias=False
    return params, w_last


# ----------------------------------------------------------------------------
# Plain-JAX f32 reference for verification
# ----------------------------------------------------------------------------
def _conv_ref(x, w, b, stride, padding):
    y = lax.conv_general_dilated(
        x, w, window_strides=(stride, stride),
        padding=[(padding, padding), (padding, padding)],
        dimension_numbers=('NCHW', 'OIHW', 'NCHW'))
    if b is not None:
        y = y + b[None, :, None, None]
    return y


def perturbation_discriminator_ref(x, params, w_last):
    h = x
    for (w, b) in params:
        h = _conv_ref(h, w, b, 2, 1)
        h = jnp.where(h >= 0.0, h, 0.01 * h)
    return _conv_ref(h, w_last, None, 1, 1)


if __name__ == "__main__":
    key = jax.random.PRNGKey(0)
    key, kx = jax.random.split(key)

    # Small config consistent with the module: conv_dim=8, repeat_num=3,
    # input (N=2, C=3, H=16, W=16) -> output (2, 1, 2, 2).
    conv_dim, repeat_num = 8, 3
    x = jax.random.normal(kx, (2, 3, 16, 16), jnp.float32)

    params, w_last = init_params(key, conv_dim=conv_dim, repeat_num=repeat_num)
    packed = pack_params(params, w_last, 16, 16)        # one-time packing

    out = jax.block_until_ready(perturbation_discriminator(x, packed))
    ref = jax.block_until_ready(perturbation_discriminator_ref(x, params, w_last))

    assert out.shape == ref.shape == (2, 1, 2, 2), out.shape
    # bf16 matmul inputs (f32 accumulate) vs. an all-f32 reference.
    assert jnp.allclose(out, ref, rtol=5e-2, atol=5e-3), (
        float(jnp.max(jnp.abs(out - ref))))

    print("KERNEL_OK")
</pallas_src>

<mosaic_0001>
module attributes {stable_mosaic.version = 11 : i64} {
  func.func @kernel(%arg0: i32, %arg1: memref<1x64x48xbf16, #tpu.memory_space<vmem>>, %arg2: memref<48x8xbf16, #tpu.memory_space<vmem>>, %arg3: memref<1x8xf32, #tpu.memory_space<vmem>>, %arg4: memref<16x16x64xbf16, #tpu.memory_space<vmem>>, %arg5: memref<16x8x16xbf16, #tpu.memory_space<vmem>>, %arg6: memref<1x16xf32, #tpu.memory_space<vmem>>, %arg7: memref<16x4x16xbf16, #tpu.memory_space<vmem>>, %arg8: memref<16x16x32xbf16, #tpu.memory_space<vmem>>, %arg9: memref<1x32xf32, #tpu.memory_space<vmem>>, %arg10: memref<9x4x4xbf16, #tpu.memory_space<vmem>>, %arg11: memref<9x32x1xbf16, #tpu.memory_space<vmem>>, %arg12: memref<1x4x1xf32, #tpu.memory_space<vmem>>) attributes {dimension_semantics = [#tpu.dimension_semantics<parallel>], iteration_bounds = array<i64: 2>, scalar_prefetch = 0 : i64, scratch_operands = 0 : i64, tpu.core_type = #tpu.core_type<tc>, window_params = [{transform_indices = @transform_0, window_bounds = array<i64: 1, 64, 48>}, {pipeline_mode = #tpu.pipeline_mode<synchronous>, transform_indices = @transform_1, window_bounds = array<i64: 48, 8>}, {pipeline_mode = #tpu.pipeline_mode<synchronous>, transform_indices = @transform_2, window_bounds = array<i64: 1, 8>}, {pipeline_mode = #tpu.pipeline_mode<synchronous>, transform_indices = @transform_3, window_bounds = array<i64: 16, 16, 64>}, {pipeline_mode = #tpu.pipeline_mode<synchronous>, transform_indices = @transform_4, window_bounds = array<i64: 16, 8, 16>}, {pipeline_mode = #tpu.pipeline_mode<synchronous>, transform_indices = @transform_5, window_bounds = array<i64: 1, 16>}, {pipeline_mode = #tpu.pipeline_mode<synchronous>, transform_indices = @transform_6, window_bounds = array<i64: 16, 4, 16>}, {pipeline_mode = #tpu.pipeline_mode<synchronous>, transform_indices = @transform_7, window_bounds = array<i64: 16, 16, 32>}, {pipeline_mode = #tpu.pipeline_mode<synchronous>, transform_indices = @transform_8, window_bounds = array<i64: 1, 32>}, {pipeline_mode = #tpu.pipeline_mode<synchronous>, transform_indices = @transform_9, window_bounds = array<i64: 9, 4, 4>}, {pipeline_mode = #tpu.pipeline_mode<synchronous>, transform_indices = @transform_10, window_bounds = array<i64: 9, 32, 1>}, {transform_indices = @transform_11, window_bounds = array<i64: 1, 4, 1>}]} {
    %c0 = arith.constant 0 : index
    %c0_0 = arith.constant 0 : index
    %c0_1 = arith.constant 0 : index
    %0 = vector.load %arg1[%c0, %c0_0, %c0_1] : memref<1x64x48xbf16, #tpu.memory_space<vmem>>, vector<1x64x48xbf16>
    %1 = vector.shape_cast %0 : vector<1x64x48xbf16> to vector<64x48xbf16>
    %c0_2 = arith.constant 0 : index
    %c0_3 = arith.constant 0 : index
    %2 = vector.load %arg2[%c0_2, %c0_3] : memref<48x8xbf16, #tpu.memory_space<vmem>>, vector<48x8xbf16>
    %cst = arith.constant dense<0.000000e+00> : vector<64x8xf32>
    %3 = tpu.matmul %1, %2, %cst {dimension_numbers = #tpu.dot_dimension_numbers<[1], [0], [0], [1], [0, 0, 1, 1], [], []>} : vector<64x48xbf16>, vector<48x8xbf16>, vector<64x8xf32> -> vector<64x8xf32>
    %c0_4 = arith.constant 0 : index
    %c0_5 = arith.constant 0 : index
    %4 = vector.load %arg3[%c0_4, %c0_5] : memref<1x8xf32, #tpu.memory_space<vmem>>, vector<1x8xf32>
    %5 = vector.broadcast %4 : vector<1x8xf32> to vector<64x8xf32>
    %6 = arith.addf %3, %5 : vector<64x8xf32>
    %cst_6 = arith.constant 0.000000e+00 : f32
    %7 = vector.broadcast %cst_6 : f32 to vector<64x8xf32>
    %8 = arith.cmpf oge, %6, %7 : vector<64x8xf32>
    %cst_7 = arith.constant 0.00999999977 : f32
    %9 = vector.broadcast %cst_7 : f32 to vector<64x8xf32>
    %10 = arith.mulf %9, %6 : vector<64x8xf32>
    %11 = arith.select %8, %6, %10 : vector<64x8xi1>, vector<64x8xf32>
    %12 = arith.truncf %11 : vector<64x8xf32> to vector<64x8xbf16>
    %cst_8 = arith.constant 0.000000e+00 : f32
    %13 = vector.broadcast %cst_8 : f32 to vector<16x16xf32>
    %c0_9 = arith.constant 0 : index
    %c0_10 = arith.constant 0 : index
    %c0_11 = arith.constant 0 : index
    %14 = vector.load %arg4[%c0_9, %c0_10, %c0_11] : memref<16x16x64xbf16, #tpu.memory_space<vmem>>, vector<1x16x64xbf16>
    %15 = vector.shape_cast %14 : vector<1x16x64xbf16> to vector<16x64xbf16>
    %cst_12 = arith.constant dense<0.000000e+00> : vector<16x8xf32>
    %16 = tpu.matmul %15, %12, %cst_12 {dimension_numbers = #tpu.dot_dimension_numbers<[1], [0], [0], [1], [0, 0, 1, 1], [], []>} : vector<16x64xbf16>, vector<64x8xbf16>, vector<16x8xf32> -> vector<16x8xf32>
    %17 = arith.truncf %16 : vector<16x8xf32> to vector<16x8xbf16>
    %c0_13 = arith.constant 0 : index
    %c0_14 = arith.constant 0 : index
    %c0_15 = arith.constant 0 : index
    %18 = vector.load %arg5[%c0_13, %c0_14, %c0_15] : memref<16x8x16xbf16, #tpu.memory_space<vmem>>, vector<1x8x16xbf16>
    %19 = vector.shape_cast %18 : vector<1x8x16xbf16> to vector<8x16xbf16>
    %cst_16 = arith.constant dense<0.000000e+00> : vector<16x16xf32>
    %20 = tpu.matmul %17, %19, %cst_16 {dimension_numbers = #tpu.dot_dimension_numbers<[1], [0], [0], [1], [0, 0, 1, 1], [], []>} : vector<16x8xbf16>, vector<8x16xbf16>, vector<16x16xf32> -> vector<16x16xf32>
    %21 = arith.addf %13, %20 : vector<16x16xf32>
    %c1 = arith.constant 1 : index
    %c0_17 = arith.constant 0 : index
    %c0_18 = arith.constant 0 : index
    %22 = vector.load %arg4[%c1, %c0_17, %c0_18] : memref<16x16x64xbf16, #tpu.memory_space<vmem>>, vector<1x16x64xbf16>
    %23 = vector.shape_cast %22 : vector<1x16x64xbf16> to vector<16x64xbf16>
    %cst_19 = arith.constant dense<0.000000e+00> : vector<16x8xf32>
    %24 = tpu.matmul %23, %12, %cst_19 {dimension_numbers = #tpu.dot_dimension_numbers<[1], [0], [0], [1], [0, 0, 1, 1], [], []>} : vector<16x64xbf16>, vector<64x8xbf16>, vector<16x8xf32> -> vector<16x8xf32>
    %25 = arith.truncf %24 : vector<16x8xf32> to vector<16x8xbf16>
    %c1_20 = arith.constant 1 : index
    %c0_21 = arith.constant 0 : index
    %c0_22 = arith.constant 0 : index
    %26 = vector.load %arg5[%c1_20, %c0_21, %c0_22] : memref<16x8x16xbf16, #tpu.memory_space<vmem>>, vector<1x8x16xbf16>
    %27 = vector.shape_cast %26 : vector<1x8x16xbf16> to vector<8x16xbf16>
    %cst_23 = arith.constant dense<0.000000e+00> : vector<16x16xf32>
    %28 = tpu.matmul %25, %27, %cst_23 {dimension_numbers = #tpu.dot_dimension_numbers<[1], [0], [0], [1], [0, 0, 1, 1], [], []>} : vector<16x8xbf16>, vector<8x16xbf16>, vector<16x16xf32> -> vector<16x16xf32>
    %29 = arith.addf %21, %28 : vector<16x16xf32>
    %c2 = arith.constant 2 : index
    %c0_24 = arith.constant 0 : index
    %c0_25 = arith.constant 0 : index
    %30 = vector.load %arg4[%c2, %c0_24, %c0_25] : memref<16x16x64xbf16, #tpu.memory_space<vmem>>, vector<1x16x64xbf16>
    %31 = vector.shape_cast %30 : vector<1x16x64xbf16> to vector<16x64xbf16>
    %cst_26 = arith.constant dense<0.000000e+00> : vector<16x8xf32>
    %32 = tpu.matmul %31, %12, %cst_26 {dimension_numbers = #tpu.dot_dimension_numbers<[1], [0], [0], [1], [0, 0, 1, 1], [], []>} : vector<16x64xbf16>, vector<64x8xbf16>, vector<16x8xf32> -> vector<16x8xf32>
    %33 = arith.truncf %32 : vector<16x8xf32> to vector<16x8xbf16>
    %c2_27 = arith.constant 2 : index
    %c0_28 = arith.constant 0 : index
    %c0_29 = arith.constant 0 : index
    %34 = vector.load %arg5[%c2_27, %c0_28, %c0_29] : memref<16x8x16xbf16, #tpu.memory_space<vmem>>, vector<1x8x16xbf16>
    %35 = vector.shape_cast %34 : vector<1x8x16xbf16> to vector<8x16xbf16>
    %cst_30 = arith.constant dense<0.000000e+00> : vector<16x16xf32>
    %36 = tpu.matmul %33, %35, %cst_30 {dimension_numbers = #tpu.dot_dimension_numbers<[1], [0], [0], [1], [0, 0, 1, 1], [], []>} : vector<16x8xbf16>, vector<8x16xbf16>, vector<16x16xf32> -> vector<16x16xf32>
    %37 = arith.addf %29, %36 : vector<16x16xf32>
    %c3 = arith.constant 3 : index
    %c0_31 = arith.constant 0 : index
    %c0_32 = arith.constant 0 : index
    %38 = vector.load %arg4[%c3, %c0_31, %c0_32] : memref<16x16x64xbf16, #tpu.memory_space<vmem>>, vector<1x16x64xbf16>
    %39 = vector.shape_cast %38 : vector<1x16x64xbf16> to vector<16x64xbf16>
    %cst_33 = arith.constant dense<0.000000e+00> : vector<16x8xf32>
    %40 = tpu.matmul %39, %12, %cst_33 {dimension_numbers = #tpu.dot_dimension_numbers<[1], [0], [0], [1], [0, 0, 1, 1], [], []>} : vector<16x64xbf16>, vector<64x8xbf16>, vector<16x8xf32> -> vector<16x8xf32>
    %41 = arith.truncf %40 : vector<16x8xf32> to vector<16x8xbf16>
    %c3_34 = arith.constant 3 : index
    %c0_35 = arith.constant 0 : index
    %c0_36 = arith.constant 0 : index
    %42 = vector.load %arg5[%c3_34, %c0_35, %c0_36] : memref<16x8x16xbf16, #tpu.memory_space<vmem>>, vector<1x8x16xbf16>
    %43 = vector.shape_cast %42 : vector<1x8x16xbf16> to vector<8x16xbf16>
    %cst_37 = arith.constant dense<0.000000e+00> : vector<16x16xf32>
    %44 = tpu.matmul %41, %43, %cst_37 {dimension_numbers = #tpu.dot_dimension_numbers<[1], [0], [0], [1], [0, 0, 1, 1], [], []>} : vector<16x8xbf16>, vector<8x16xbf16>, vector<16x16xf32> -> vector<16x16xf32>
    %45 = arith.addf %37, %44 : vector<16x16xf32>
    %c4 = arith.constant 4 : index
    %c0_38 = arith.constant 0 : index
    %c0_39 = arith.constant 0 : index
    %46 = vector.load %arg4[%c4, %c0_38, %c0_39] : memref<16x16x64xbf16, #tpu.memory_space<vmem>>, vector<1x16x64xbf16>
    %47 = vector.shape_cast %46 : vector<1x16x64xbf16> to vector<16x64xbf16>
    %cst_40 = arith.constant dense<0.000000e+00> : vector<16x8xf32>
    %48 = tpu.matmul %47, %12, %cst_40 {dimension_numbers = #tpu.dot_dimension_numbers<[1], [0], [0], [1], [0, 0, 1, 1], [], []>} : vector<16x64xbf16>, vector<64x8xbf16>, vector<16x8xf32> -> vector<16x8xf32>
    %49 = arith.truncf %48 : vector<16x8xf32> to vector<16x8xbf16>
    %c4_41 = arith.constant 4 : index
    %c0_42 = arith.constant 0 : index
    %c0_43 = arith.constant 0 : index
    %50 = vector.load %arg5[%c4_41, %c0_42, %c0_43] : memref<16x8x16xbf16, #tpu.memory_space<vmem>>, vector<1x8x16xbf16>
    %51 = vector.shape_cast %50 : vector<1x8x16xbf16> to vector<8x16xbf16>
    %cst_44 = arith.constant dense<0.000000e+00> : vector<16x16xf32>
    %52 = tpu.matmul %49, %51, %cst_44 {dimension_numbers = #tpu.dot_dimension_numbers<[1], [0], [0], [1], [0, 0, 1, 1], [], []>} : vector<16x8xbf16>, vector<8x16xbf16>, vector<16x16xf32> -> vector<16x16xf32>
    %53 = arith.addf %45, %52 : vector<16x16xf32>
    %c5 = arith.constant 5 : index
    %c0_45 = arith.constant 0 : index
    %c0_46 = arith.constant 0 : index
    %54 = vector.load %arg4[%c5, %c0_45, %c0_46] : memref<16x16x64xbf16, #tpu.memory_space<vmem>>, vector<1x16x64xbf16>
    %55 = vector.shape_cast %54 : vector<1x16x64xbf16> to vector<16x64xbf16>
    %cst_47 = arith.constant dense<0.000000e+00> : vector<16x8xf32>
    %56 = tpu.matmul %55, %12, %cst_47 {dimension_numbers = #tpu.dot_dimension_numbers<[1], [0], [0], [1], [0, 0, 1, 1], [], []>} : vector<16x64xbf16>, vector<64x8xbf16>, vector<16x8xf32> -> vector<16x8xf32>
    %57 = arith.truncf %56 : vector<16x8xf32> to vector<16x8xbf16>
    %c5_48 = arith.constant 5 : index
    %c0_49 = arith.constant 0 : index
    %c0_50 = arith.constant 0 : index
    %58 = vector.load %arg5[%c5_48, %c0_49, %c0_50] : memref<16x8x16xbf16, #tpu.memory_space<vmem>>, vector<1x8x16xbf16>
    %59 = vector.shape_cast %58 : vector<1x8x16xbf16> to vector<8x16xbf16>
    %cst_51 = arith.constant dense<0.000000e+00> : vector<16x16xf32>
    %60 = tpu.matmul %57, %59, %cst_51 {dimension_numbers = #tpu.dot_dimension_numbers<[1], [0], [0], [1], [0, 0, 1, 1], [], []>} : vector<16x8xbf16>, vector<8x16xbf16>, vector<16x16xf32> -> vector<16x16xf32>
    %61 = arith.addf %53, %60 : vector<16x16xf32>
    %c6 = arith.constant 6 : index
    %c0_52 = arith.constant 0 : index
    %c0_53 = arith.constant 0 : index
    %62 = vector.load %arg4[%c6, %c0_52, %c0_53] : memref<16x16x64xbf16, #tpu.memory_space<vmem>>, vector<1x16x64xbf16>
    %63 = vector.shape_cast %62 : vector<1x16x64xbf16> to vector<16x64xbf16>
    %cst_54 = arith.constant dense<0.000000e+00> : vector<16x8xf32>
    %64 = tpu.matmul %63, %12, %cst_54 {dimension_numbers = #tpu.dot_dimension_numbers<[1], [0], [0], [1], [0, 0, 1, 1], [], []>} : vector<16x64xbf16>, vector<64x8xbf16>, vector<16x8xf32> -> vector<16x8xf32>
    %65 = arith.truncf %64 : vector<16x8xf32> to vector<16x8xbf16>
    %c6_55 = arith.constant 6 : index
    %c0_56 = arith.constant 0 : index
    %c0_57 = arith.constant 0 : index
    %66 = vector.load %arg5[%c6_55, %c0_56, %c0_57] : memref<16x8x16xbf16, #tpu.memory_space<vmem>>, vector<1x8x16xbf16>
    %67 = vector.shape_cast %66 : vector<1x8x16xbf16> to vector<8x16xbf16>
    %cst_58 = arith.constant dense<0.000000e+00> : vector<16x16xf32>
    %68 = tpu.matmul %65, %67, %cst_58 {dimension_numbers = #tpu.dot_dimension_numbers<[1], [0], [0], [1], [0, 0, 1, 1], [], []>} : vector<16x8xbf16>, vector<8x16xbf16>, vector<16x16xf32> -> vector<16x16xf32>
    %69 = arith.addf %61, %68 : vector<16x16xf32>
    %c7 = arith.constant 7 : index
    %c0_59 = arith.constant 0 : index
    %c0_60 = arith.constant 0 : index
    %70 = vector.load %arg4[%c7, %c0_59, %c0_60] : memref<16x16x64xbf16, #tpu.memory_space<vmem>>, vector<1x16x64xbf16>
    %71 = vector.shape_cast %70 : vector<1x16x64xbf16> to vector<16x64xbf16>
    %cst_61 = arith.constant dense<0.000000e+00> : vector<16x8xf32>
    %72 = tpu.matmul %71, %12, %cst_61 {dimension_numbers = #tpu.dot_dimension_numbers<[1], [0], [0], [1], [0, 0, 1, 1], [], []>} : vector<16x64xbf16>, vector<64x8xbf16>, vector<16x8xf32> -> vector<16x8xf32>
    %73 = arith.truncf %72 : vector<16x8xf32> to vector<16x8xbf16>
    %c7_62 = arith.constant 7 : index
    %c0_63 = arith.constant 0 : index
    %c0_64 = arith.constant 0 : index
    %74 = vector.load %arg5[%c7_62, %c0_63, %c0_64] : memref<16x8x16xbf16, #tpu.memory_space<vmem>>, vector<1x8x16xbf16>
    %75 = vector.shape_cast %74 : vector<1x8x16xbf16> to vector<8x16xbf16>
    %cst_65 = arith.constant dense<0.000000e+00> : vector<16x16xf32>
    %76 = tpu.matmul %73, %75, %cst_65 {dimension_numbers = #tpu.dot_dimension_numbers<[1], [0], [0], [1], [0, 0, 1, 1], [], []>} : vector<16x8xbf16>, vector<8x16xbf16>, vector<16x16xf32> -> vector<16x16xf32>
    %77 = arith.addf %69, %76 : vector<16x16xf32>
    %c8 = arith.constant 8 : index
    %c0_66 = arith.constant 0 : index
    %c0_67 = arith.constant 0 : index
    %78 = vector.load %arg4[%c8, %c0_66, %c0_67] : memref<16x16x64xbf16, #tpu.memory_space<vmem>>, vector<1x16x64xbf16>
    %79 = vector.shape_cast %78 : vector<1x16x64xbf16> to vector<16x64xbf16>
    %cst_68 = arith.constant dense<0.000000e+00> : vector<16x8xf32>
    %80 = tpu.matmul %79, %12, %cst_68 {dimension_numbers = #tpu.dot_dimension_numbers<[1], [0], [0], [1], [0, 0, 1, 1], [], []>} : vector<16x64xbf16>, vector<64x8xbf16>, vector<16x8xf32> -> vector<16x8xf32>
    %81 = arith.truncf %80 : vector<16x8xf32> to vector<16x8xbf16>
    %c8_69 = arith.constant 8 : index
    %c0_70 = arith.constant 0 : index
    %c0_71 = arith.constant 0 : index
    %82 = vector.load %arg5[%c8_69, %c0_70, %c0_71] : memref<16x8x16xbf16, #tpu.memory_space<vmem>>, vector<1x8x16xbf16>
    %83 = vector.shape_cast %82 : vector<1x8x16xbf16> to vector<8x16xbf16>
    %cst_72 = arith.constant dense<0.000000e+00> : vector<16x16xf32>
    %84 = tpu.matmul %81, %83, %cst_72 {dimension_numbers = #tpu.dot_dimension_numbers<[1], [0], [0], [1], [0, 0, 1, 1], [], []>} : vector<16x8xbf16>, vector<8x16xbf16>, vector<16x16xf32> -> vector<16x16xf32>
    %85 = arith.addf %77, %84 : vector<16x16xf32>
    %c9 = arith.constant 9 : index
    %c0_73 = arith.constant 0 : index
    %c0_74 = arith.constant 0 : index
    %86 = vector.load %arg4[%c9, %c0_73, %c0_74] : memref<16x16x64xbf16, #tpu.memory_space<vmem>>, vector<1x16x64xbf16>
    %87 = vector.shape_cast %86 : vector<1x16x64xbf16> to vector<16x64xbf16>
    %cst_75 = arith.constant dense<0.000000e+00> : vector<16x8xf32>
    %88 = tpu.matmul %87, %12, %cst_75 {dimension_numbers = #tpu.dot_dimension_numbers<[1], [0], [0], [1], [0, 0, 1, 1], [], []>} : vector<16x64xbf16>, vector<64x8xbf16>, vector<16x8xf32> -> vector<16x8xf32>
    %89 = arith.truncf %88 : vector<16x8xf32> to vector<16x8xbf16>
    %c9_76 = arith.constant 9 : index
    %c0_77 = arith.constant 0 : index
    %c0_78 = arith.constant 0 : index
    %90 = vector.load %arg5[%c9_76, %c0_77, %c0_78] : memref<16x8x16xbf16, #tpu.memory_space<vmem>>, vector<1x8x16xbf16>
    %91 = vector.shape_cast %90 : vector<1x8x16xbf16> to vector<8x16xbf16>
    %cst_79 = arith.constant dense<0.000000e+00> : vector<16x16xf32>
    %92 = tpu.matmul %89, %91, %cst_79 {dimension_numbers = #tpu.dot_dimension_numbers<[1], [0], [0], [1], [0, 0, 1, 1], [], []>} : vector<16x8xbf16>, vector<8x16xbf16>, vector<16x16xf32> -> vector<16x16xf32>
    %93 = arith.addf %85, %92 : vector<16x16xf32>
    %c10 = arith.constant 10 : index
    %c0_80 = arith.constant 0 : index
    %c0_81 = arith.constant 0 : index
    %94 = vector.load %arg4[%c10, %c0_80, %c0_81] : memref<16x16x64xbf16, #tpu.memory_space<vmem>>, vector<1x16x64xbf16>
    %95 = vector.shape_cast %94 : vector<1x16x64xbf16> to vector<16x64xbf16>
    %cst_82 = arith.constant dense<0.000000e+00> : vector<16x8xf32>
    %96 = tpu.matmul %95, %12, %cst_82 {dimension_numbers = #tpu.dot_dimension_numbers<[1], [0], [0], [1], [0, 0, 1, 1], [], []>} : vector<16x64xbf16>, vector<64x8xbf16>, vector<16x8xf32> -> vector<16x8xf32>
    %97 = arith.truncf %96 : vector<16x8xf32> to vector<16x8xbf16>
    %c10_83 = arith.constant 10 : index
    %c0_84 = arith.constant 0 : index
    %c0_85 = arith.constant 0 : index
    %98 = vector.load %arg5[%c10_83, %c0_84, %c0_85] : memref<16x8x16xbf16, #tpu.memory_space<vmem>>, vector<1x8x16xbf16>
    %99 = vector.shape_cast %98 : vector<1x8x16xbf16> to vector<8x16xbf16>
    %cst_86 = arith.constant dense<0.000000e+00> : vector<16x16xf32>
    %100 = tpu.matmul %97, %99, %cst_86 {dimension_numbers = #tpu.dot_dimension_numbers<[1], [0], [0], [1], [0, 0, 1, 1], [], []>} : vector<16x8xbf16>, vector<8x16xbf16>, vector<16x16xf32> -> vector<16x16xf32>
    %101 = arith.addf %93, %100 : vector<16x16xf32>
    %c11 = arith.constant 11 : index
    %c0_87 = arith.constant 0 : index
    %c0_88 = arith.constant 0 : index
    %102 = vector.load %arg4[%c11, %c0_87, %c0_88] : memref<16x16x64xbf16, #tpu.memory_space<vmem>>, vector<1x16x64xbf16>
    %103 = vector.shape_cast %102 : vector<1x16x64xbf16> to vector<16x64xbf16>
    %cst_89 = arith.constant dense<0.000000e+00> : vector<16x8xf32>
    %104 = tpu.matmul %103, %12, %cst_89 {dimension_numbers = #tpu.dot_dimension_numbers<[1], [0], [0], [1], [0, 0, 1, 1], [], []>} : vector<16x64xbf16>, vector<64x8xbf16>, vector<16x8xf32> -> vector<16x8xf32>
    %105 = arith.truncf %104 : vector<16x8xf32> to vector<16x8xbf16>
    %c11_90 = arith.constant 11 : index
    %c0_91 = arith.constant 0 : index
    %c0_92 = arith.constant 0 : index
    %106 = vector.load %arg5[%c11_90, %c0_91, %c0_92] : memref<16x8x16xbf16, #tpu.memory_space<vmem>>, vector<1x8x16xbf16>
    %107 = vector.shape_cast %106 : vector<1x8x16xbf16> to vector<8x16xbf16>
    %cst_93 = arith.constant dense<0.000000e+00> : vector<16x16xf32>
    %108 = tpu.matmul %105, %107, %cst_93 {dimension_numbers = #tpu.dot_dimension_numbers<[1], [0], [0], [1], [0, 0, 1, 1], [], []>} : vector<16x8xbf16>, vector<8x16xbf16>, vector<16x16xf32> -> vector<16x16xf32>
    %109 = arith.addf %101, %108 : vector<16x16xf32>
    %c12 = arith.constant 12 : index
    %c0_94 = arith.constant 0 : index
    %c0_95 = arith.constant 0 : index
    %110 = vector.load %arg4[%c12, %c0_94, %c0_95] : memref<16x16x64xbf16, #tpu.memory_space<vmem>>, vector<1x16x64xbf16>
    %111 = vector.shape_cast %110 : vector<1x16x64xbf16> to vector<16x64xbf16>
    %cst_96 = arith.constant dense<0.000000e+00> : vector<16x8xf32>
    %112 = tpu.matmul %111, %12, %cst_96 {dimension_numbers = #tpu.dot_dimension_numbers<[1], [0], [0], [1], [0, 0, 1, 1], [], []>} : vector<16x64xbf16>, vector<64x8xbf16>, vector<16x8xf32> -> vector<16x8xf32>
    %113 = arith.truncf %112 : vector<16x8xf32> to vector<16x8xbf16>
    %c12_97 = arith.constant 12 : index
    %c0_98 = arith.constant 0 : index
    %c0_99 = arith.constant 0 : index
    %114 = vector.load %arg5[%c12_97, %c0_98, %c0_99] : memref<16x8x16xbf16, #tpu.memory_space<vmem>>, vector<1x8x16xbf16>
    %115 = vector.shape_cast %114 : vector<1x8x16xbf16> to vector<8x16xbf16>
    %cst_100 = arith.constant dense<0.000000e+00> : vector<16x16xf32>
    %116 = tpu.matmul %113, %115, %cst_100 {dimension_numbers = #tpu.dot_dimension_numbers<[1], [0], [0], [1], [0, 0, 1, 1], [], []>} : vector<16x8xbf16>, vector<8x16xbf16>, vector<16x16xf32> -> vector<16x16xf32>
    %117 = arith.addf %109, %116 : vector<16x16xf32>
    %c13 = arith.constant 13 : index
    %c0_101 = arith.constant 0 : index
    %c0_102 = arith.constant 0 : index
    %118 = vector.load %arg4[%c13, %c0_101, %c0_102] : memref<16x16x64xbf16, #tpu.memory_space<vmem>>, vector<1x16x64xbf16>
    %119 = vector.shape_cast %118 : vector<1x16x64xbf16> to vector<16x64xbf16>
    %cst_103 = arith.constant dense<0.000000e+00> : vector<16x8xf32>
    %120 = tpu.matmul %119, %12, %cst_103 {dimension_numbers = #tpu.dot_dimension_numbers<[1], [0], [0], [1], [0, 0, 1, 1], [], []>} : vector<16x64xbf16>, vector<64x8xbf16>, vector<16x8xf32> -> vector<16x8xf32>
    %121 = arith.truncf %120 : vector<16x8xf32> to vector<16x8xbf16>
    %c13_104 = arith.constant 13 : index
    %c0_105 = arith.constant 0 : index
    %c0_106 = arith.constant 0 : index
    %122 = vector.load %arg5[%c13_104, %c0_105, %c0_106] : memref<16x8x16xbf16, #tpu.memory_space<vmem>>, vector<1x8x16xbf16>
    %123 = vector.shape_cast %122 : vector<1x8x16xbf16> to vector<8x16xbf16>
    %cst_107 = arith.constant dense<0.000000e+00> : vector<16x16xf32>
    %124 = tpu.matmul %121, %123, %cst_107 {dimension_numbers = #tpu.dot_dimension_numbers<[1], [0], [0], [1], [0, 0, 1, 1], [], []>} : vector<16x8xbf16>, vector<8x16xbf16>, vector<16x16xf32> -> vector<16x16xf32>
    %125 = arith.addf %117, %124 : vector<16x16xf32>
    %c14 = arith.constant 14 : index
    %c0_108 = arith.constant 0 : index
    %c0_109 = arith.constant 0 : index
    %126 = vector.load %arg4[%c14, %c0_108, %c0_109] : memref<16x16x64xbf16, #tpu.memory_space<vmem>>, vector<1x16x64xbf16>
    %127 = vector.shape_cast %126 : vector<1x16x64xbf16> to vector<16x64xbf16>
    %cst_110 = arith.constant dense<0.000000e+00> : vector<16x8xf32>
    %128 = tpu.matmul %127, %12, %cst_110 {dimension_numbers = #tpu.dot_dimension_numbers<[1], [0], [0], [1], [0, 0, 1, 1], [], []>} : vector<16x64xbf16>, vector<64x8xbf16>, vector<16x8xf32> -> vector<16x8xf32>
    %129 = arith.truncf %128 : vector<16x8xf32> to vector<16x8xbf16>
    %c14_111 = arith.constant 14 : index
    %c0_112 = arith.constant 0 : index
    %c0_113 = arith.constant 0 : index
    %130 = vector.load %arg5[%c14_111, %c0_112, %c0_113] : memref<16x8x16xbf16, #tpu.memory_space<vmem>>, vector<1x8x16xbf16>
    %131 = vector.shape_cast %130 : vector<1x8x16xbf16> to vector<8x16xbf16>
    %cst_114 = arith.constant dense<0.000000e+00> : vector<16x16xf32>
    %132 = tpu.matmul %129, %131, %cst_114 {dimension_numbers = #tpu.dot_dimension_numbers<[1], [0], [0], [1], [0, 0, 1, 1], [], []>} : vector<16x8xbf16>, vector<8x16xbf16>, vector<16x16xf32> -> vector<16x16xf32>
    %133 = arith.addf %125, %132 : vector<16x16xf32>
    %c15 = arith.constant 15 : index
    %c0_115 = arith.constant 0 : index
    %c0_116 = arith.constant 0 : index
    %134 = vector.load %arg4[%c15, %c0_115, %c0_116] : memref<16x16x64xbf16, #tpu.memory_space<vmem>>, vector<1x16x64xbf16>
    %135 = vector.shape_cast %134 : vector<1x16x64xbf16> to vector<16x64xbf16>
    %cst_117 = arith.constant dense<0.000000e+00> : vector<16x8xf32>
    %136 = tpu.matmul %135, %12, %cst_117 {dimension_numbers = #tpu.dot_dimension_numbers<[1], [0], [0], [1], [0, 0, 1, 1], [], []>} : vector<16x64xbf16>, vector<64x8xbf16>, vector<16x8xf32> -> vector<16x8xf32>
    %137 = arith.truncf %136 : vector<16x8xf32> to vector<16x8xbf16>
    %c15_118 = arith.constant 15 : index
    %c0_119 = arith.constant 0 : index
    %c0_120 = arith.constant 0 : index
    %138 = vector.load %arg5[%c15_118, %c0_119, %c0_120] : memref<16x8x16xbf16, #tpu.memory_space<vmem>>, vector<1x8x16xbf16>
    %139 = vector.shape_cast %138 : vector<1x8x16xbf16> to vector<8x16xbf16>
    %cst_121 = arith.constant dense<0.000000e+00> : vector<16x16xf32>
    %140 = tpu.matmul %137, %139, %cst_121 {dimension_numbers = #tpu.dot_dimension_numbers<[1], [0], [0], [1], [0, 0, 1, 1], [], []>} : vector<16x8xbf16>, vector<8x16xbf16>, vector<16x16xf32> -> vector<16x16xf32>
    %141 = arith.addf %133, %140 : vector<16x16xf32>
    %c0_122 = arith.constant 0 : index
    %c0_123 = arith.constant 0 : index
    %142 = vector.load %arg6[%c0_122, %c0_123] : memref<1x16xf32, #tpu.memory_space<vmem>>, vector<1x16xf32>
    %143 = vector.broadcast %142 : vector<1x16xf32> to vector<16x16xf32>
    %144 = arith.addf %141, %143 : vector<16x16xf32>
    %cst_124 = arith.constant 0.000000e+00 : f32
    %145 = vector.broadcast %cst_124 : f32 to vector<16x16xf32>
    %146 = arith.cmpf oge, %144, %145 : vector<16x16xf32>
    %cst_125 = arith.constant 0.00999999977 : f32
    %147 = vector.broadcast %cst_125 : f32 to vector<16x16xf32>
    %148 = arith.mulf %147, %144 : vector<16x16xf32>
    %149 = arith.select %146, %144, %148 : vector<16x16xi1>, vector<16x16xf32>
    %150 = arith.truncf %149 : vector<16x16xf32> to vector<16x16xbf16>
    %cst_126 = arith.constant 0.000000e+00 : f32
    %151 = vector.broadcast %cst_126 : f32 to vector<4x32xf32>
    %c0_127 = arith.constant 0 : index
    %c0_128 = arith.constant 0 : index
    %c0_129 = arith.constant 0 : index
    %152 = vector.load %arg7[%c0_127, %c0_128, %c0_129] : memref<16x4x16xbf16, #tpu.memory_space<vmem>>, vector<1x4x16xbf16>
    %153 = vector.shape_cast %152 : vector<1x4x16xbf16> to vector<4x16xbf16>
    %cst_130 = arith.constant dense<0.000000e+00> : vector<4x16xf32>
    %154 = tpu.matmul %153, %150, %cst_130 {dimension_numbers = #tpu.dot_dimension_numbers<[1], [0], [0], [1], [0, 0, 1, 1], [], []>} : vector<4x16xbf16>, vector<16x16xbf16>, vector<4x16xf32> -> vector<4x16xf32>
    %155 = arith.truncf %154 : vector<4x16xf32> to vector<4x16xbf16>
    %c0_131 = arith.constant 0 : index
    %c0_132 = arith.constant 0 : index
    %c0_133 = arith.constant 0 : index
    %156 = vector.load %arg8[%c0_131, %c0_132, %c0_133] : memref<16x16x32xbf16, #tpu.memory_space<vmem>>, vector<1x16x32xbf16>
    %157 = vector.shape_cast %156 : vector<1x16x32xbf16> to vector<16x32xbf16>
    %cst_134 = arith.constant dense<0.000000e+00> : vector<4x32xf32>
    %158 = tpu.matmul %155, %157, %cst_134 {dimension_numbers = #tpu.dot_dimension_numbers<[1], [0], [0], [1], [0, 0, 1, 1], [], []>} : vector<4x16xbf16>, vector<16x32xbf16>, vector<4x32xf32> -> vector<4x32xf32>
    %159 = arith.addf %151, %158 : vector<4x32xf32>
    %c1_135 = arith.constant 1 : index
    %c0_136 = arith.constant 0 : index
    %c0_137 = arith.constant 0 : index
    %160 = vector.load %arg7[%c1_135, %c0_136, %c0_137] : memref<16x4x16xbf16, #tpu.memory_space<vmem>>, vector<1x4x16xbf16>
    %161 = vector.shape_cast %160 : vector<1x4x16xbf16> to vector<4x16xbf16>
    %cst_138 = arith.constant dense<0.000000e+00> : vector<4x16xf32>
    %162 = tpu.matmul %161, %150, %cst_138 {dimension_numbers = #tpu.dot_dimension_numbers<[1], [0], [0], [1], [0, 0, 1, 1], [], []>} : vector<4x16xbf16>, vector<16x16xbf16>, vector<4x16xf32> -> vector<4x16xf32>
    %163 = arith.truncf %162 : vector<4x16xf32> to vector<4x16xbf16>
    %c1_139 = arith.constant 1 : index
    %c0_140 = arith.constant 0 : index
    %c0_141 = arith.constant 0 : index
    %164 = vector.load %arg8[%c1_139, %c0_140, %c0_141] : memref<16x16x32xbf16, #tpu.memory_space<vmem>>, vector<1x16x32xbf16>
    %165 = vector.shape_cast %164 : vector<1x16x32xbf16> to vector<16x32xbf16>
    %cst_142 = arith.constant dense<0.000000e+00> : vector<4x32xf32>
    %166 = tpu.matmul %163, %165, %cst_142 {dimension_numbers = #tpu.dot_dimension_numbers<[1], [0], [0], [1], [0, 0, 1, 1], [], []>} : vector<4x16xbf16>, vector<16x32xbf16>, vector<4x32xf32> -> vector<4x32xf32>
    %167 = arith.addf %159, %166 : vector<4x32xf32>
    %c2_143 = arith.constant 2 : index
    %c0_144 = arith.constant 0 : index
    %c0_145 = arith.constant 0 : index
    %168 = vector.load %arg7[%c2_143, %c0_144, %c0_145] : memref<16x4x16xbf16, #tpu.memory_space<vmem>>, vector<1x4x16xbf16>
    %169 = vector.shape_cast %168 : vector<1x4x16xbf16> to vector<4x16xbf16>
    %cst_146 = arith.constant dense<0.000000e+00> : vector<4x16xf32>
    %170 = tpu.matmul %169, %150, %cst_146 {dimension_numbers = #tpu.dot_dimension_numbers<[1], [0], [0], [1], [0, 0, 1, 1], [], []>} : vector<4x16xbf16>, vector<16x16xbf16>, vector<4x16xf32> -> vector<4x16xf32>
    %171 = arith.truncf %170 : vector<4x16xf32> to vector<4x16xbf16>
    %c2_147 = arith.constant 2 : index
    %c0_148 = arith.constant 0 : index
    %c0_149 = arith.constant 0 : index
    %172 = vector.load %arg8[%c2_147, %c0_148, %c0_149] : memref<16x16x32xbf16, #tpu.memory_space<vmem>>, vector<1x16x32xbf16>
    %173 = vector.shape_cast %172 : vector<1x16x32xbf16> to vector<16x32xbf16>
    %cst_150 = arith.constant dense<0.000000e+00> : vector<4x32xf32>
    %174 = tpu.matmul %171, %173, %cst_150 {dimension_numbers = #tpu.dot_dimension_numbers<[1], [0], [0], [1], [0, 0, 1, 1], [], []>} : vector<4x16xbf16>, vector<16x32xbf16>, vector<4x32xf32> -> vector<4x32xf32>
    %175 = arith.addf %167, %174 : vector<4x32xf32>
    %c3_151 = arith.constant 3 : index
    %c0_152 = arith.constant 0 : index
    %c0_153 = arith.constant 0 : index
    %176 = vector.load %arg7[%c3_151, %c0_152, %c0_153] : memref<16x4x16xbf16, #tpu.memory_space<vmem>>, vector<1x4x16xbf16>
    %177 = vector.shape_cast %176 : vector<1x4x16xbf16> to vector<4x16xbf16>
    %cst_154 = arith.constant dense<0.000000e+00> : vector<4x16xf32>
    %178 = tpu.matmul %177, %150, %cst_154 {dimension_numbers = #tpu.dot_dimension_numbers<[1], [0], [0], [1], [0, 0, 1, 1], [], []>} : vector<4x16xbf16>, vector<16x16xbf16>, vector<4x16xf32> -> vector<4x16xf32>
    %179 = arith.truncf %178 : vector<4x16xf32> to vector<4x16xbf16>
    %c3_155 = arith.constant 3 : index
    %c0_156 = arith.constant 0 : index
    %c0_157 = arith.constant 0 : index
    %180 = vector.load %arg8[%c3_155, %c0_156, %c0_157] : memref<16x16x32xbf16, #tpu.memory_space<vmem>>, vector<1x16x32xbf16>
    %181 = vector.shape_cast %180 : vector<1x16x32xbf16> to vector<16x32xbf16>
    %cst_158 = arith.constant dense<0.000000e+00> : vector<4x32xf32>
    %182 = tpu.matmul %179, %181, %cst_158 {dimension_numbers = #tpu.dot_dimension_numbers<[1], [0], [0], [1], [0, 0, 1, 1], [], []>} : vector<4x16xbf16>, vector<16x32xbf16>, vector<4x32xf32> -> vector<4x32xf32>
    %183 = arith.addf %175, %182 : vector<4x32xf32>
    %c4_159 = arith.constant 4 : index
    %c0_160 = arith.constant 0 : index
    %c0_161 = arith.constant 0 : index
    %184 = vector.load %arg7[%c4_159, %c0_160, %c0_161] : memref<16x4x16xbf16, #tpu.memory_space<vmem>>, vector<1x4x16xbf16>
    %185 = vector.shape_cast %184 : vector<1x4x16xbf16> to vector<4x16xbf16>
    %cst_162 = arith.constant dense<0.000000e+00> : vector<4x16xf32>
    %186 = tpu.matmul %185, %150, %cst_162 {dimension_numbers = #tpu.dot_dimension_numbers<[1], [0], [0], [1], [0, 0, 1, 1], [], []>} : vector<4x16xbf16>, vector<16x16xbf16>, vector<4x16xf32> -> vector<4x16xf32>
    %187 = arith.truncf %186 : vector<4x16xf32> to vector<4x16xbf16>
    %c4_163 = arith.constant 4 : index
    %c0_164 = arith.constant 0 : index
    %c0_165 = arith.constant 0 : index
    %188 = vector.load %arg8[%c4_163, %c0_164, %c0_165] : memref<16x16x32xbf16, #tpu.memory_space<vmem>>, vector<1x16x32xbf16>
    %189 = vector.shape_cast %188 : vector<1x16x32xbf16> to vector<16x32xbf16>
    %cst_166 = arith.constant dense<0.000000e+00> : vector<4x32xf32>
    %190 = tpu.matmul %187, %189, %cst_166 {dimension_numbers = #tpu.dot_dimension_numbers<[1], [0], [0], [1], [0, 0, 1, 1], [], []>} : vector<4x16xbf16>, vector<16x32xbf16>, vector<4x32xf32> -> vector<4x32xf32>
    %191 = arith.addf %183, %190 : vector<4x32xf32>
    %c5_167 = arith.constant 5 : index
    %c0_168 = arith.constant 0 : index
    %c0_169 = arith.constant 0 : index
    %192 = vector.load %arg7[%c5_167, %c0_168, %c0_169] : memref<16x4x16xbf16, #tpu.memory_space<vmem>>, vector<1x4x16xbf16>
    %193 = vector.shape_cast %192 : vector<1x4x16xbf16> to vector<4x16xbf16>
    %cst_170 = arith.constant dense<0.000000e+00> : vector<4x16xf32>
    %194 = tpu.matmul %193, %150, %cst_170 {dimension_numbers = #tpu.dot_dimension_numbers<[1], [0], [0], [1], [0, 0, 1, 1], [], []>} : vector<4x16xbf16>, vector<16x16xbf16>, vector<4x16xf32> -> vector<4x16xf32>
    %195 = arith.truncf %194 : vector<4x16xf32> to vector<4x16xbf16>
    %c5_171 = arith.constant 5 : index
    %c0_172 = arith.constant 0 : index
    %c0_173 = arith.constant 0 : index
    %196 = vector.load %arg8[%c5_171, %c0_172, %c0_173] : memref<16x16x32xbf16, #tpu.memory_space<vmem>>, vector<1x16x32xbf16>
    %197 = vector.shape_cast %196 : vector<1x16x32xbf16> to vector<16x32xbf16>
    %cst_174 = arith.constant dense<0.000000e+00> : vector<4x32xf32>
    %198 = tpu.matmul %195, %197, %cst_174 {dimension_numbers = #tpu.dot_dimension_numbers<[1], [0], [0], [1], [0, 0, 1, 1], [], []>} : vector<4x16xbf16>, vector<16x32xbf16>, vector<4x32xf32> -> vector<4x32xf32>
    %199 = arith.addf %191, %198 : vector<4x32xf32>
    %c6_175 = arith.constant 6 : index
    %c0_176 = arith.constant 0 : index
    %c0_177 = arith.constant 0 : index
    %200 = vector.load %arg7[%c6_175, %c0_176, %c0_177] : memref<16x4x16xbf16, #tpu.memory_space<vmem>>, vector<1x4x16xbf16>
    %201 = vector.shape_cast %200 : vector<1x4x16xbf16> to vector<4x16xbf16>
    %cst_178 = arith.constant dense<0.000000e+00> : vector<4x16xf32>
    %202 = tpu.matmul %201, %150, %cst_178 {dimension_numbers = #tpu.dot_dimension_numbers<[1], [0], [0], [1], [0, 0, 1, 1], [], []>} : vector<4x16xbf16>, vector<16x16xbf16>, vector<4x16xf32> -> vector<4x16xf32>
    %203 = arith.truncf %202 : vector<4x16xf32> to vector<4x16xbf16>
    %c6_179 = arith.constant 6 : index
    %c0_180 = arith.constant 0 : index
    %c0_181 = arith.constant 0 : index
    %204 = vector.load %arg8[%c6_179, %c0_180, %c0_181] : memref<16x16x32xbf16, #tpu.memory_space<vmem>>, vector<1x16x32xbf16>
    %205 = vector.shape_cast %204 : vector<1x16x32xbf16> to vector<16x32xbf16>
    %cst_182 = arith.constant dense<0.000000e+00> : vector<4x32xf32>
    %206 = tpu.matmul %203, %205, %cst_182 {dimension_numbers = #tpu.dot_dimension_numbers<[1], [0], [0], [1], [0, 0, 1, 1], [], []>} : vector<4x16xbf16>, vector<16x32xbf16>, vector<4x32xf32> -> vector<4x32xf32>
    %207 = arith.addf %199, %206 : vector<4x32xf32>
    %c7_183 = arith.constant 7 : index
    %c0_184 = arith.constant 0 : index
    %c0_185 = arith.constant 0 : index
    %208 = vector.load %arg7[%c7_183, %c0_184, %c0_185] : memref<16x4x16xbf16, #tpu.memory_space<vmem>>, vector<1x4x16xbf16>
    %209 = vector.shape_cast %208 : vector<1x4x16xbf16> to vector<4x16xbf16>
    %cst_186 = arith.constant dense<0.000000e+00> : vector<4x16xf32>
    %210 = tpu.matmul %209, %150, %cst_186 {dimension_numbers = #tpu.dot_dimension_numbers<[1], [0], [0], [1], [0, 0, 1, 1], [], []>} : vector<4x16xbf16>, vector<16x16xbf16>, vector<4x16xf32> -> vector<4x16xf32>
    %211 = arith.truncf %210 : vector<4x16xf32> to vector<4x16xbf16>
    %c7_187 = arith.constant 7 : index
    %c0_188 = arith.constant 0 : index
    %c0_189 = arith.constant 0 : index
    %212 = vector.load %arg8[%c7_187, %c0_188, %c0_189] : memref<16x16x32xbf16, #tpu.memory_space<vmem>>, vector<1x16x32xbf16>
    %213 = vector.shape_cast %212 : vector<1x16x32xbf16> to vector<16x32xbf16>
    %cst_190 = arith.constant dense<0.000000e+00> : vector<4x32xf32>
    %214 = tpu.matmul %211, %213, %cst_190 {dimension_numbers = #tpu.dot_dimension_numbers<[1], [0], [0], [1], [0, 0, 1, 1], [], []>} : vector<4x16xbf16>, vector<16x32xbf16>, vector<4x32xf32> -> vector<4x32xf32>
    %215 = arith.addf %207, %214 : vector<4x32xf32>
    %c8_191 = arith.constant 8 : index
    %c0_192 = arith.constant 0 : index
    %c0_193 = arith.constant 0 : index
    %216 = vector.load %arg7[%c8_191, %c0_192, %c0_193] : memref<16x4x16xbf16, #tpu.memory_space<vmem>>, vector<1x4x16xbf16>
    %217 = vector.shape_cast %216 : vector<1x4x16xbf16> to vector<4x16xbf16>
    %cst_194 = arith.constant dense<0.000000e+00> : vector<4x16xf32>
    %218 = tpu.matmul %217, %150, %cst_194 {dimension_numbers = #tpu.dot_dimension_numbers<[1], [0], [0], [1], [0, 0, 1, 1], [], []>} : vector<4x16xbf16>, vector<16x16xbf16>, vector<4x16xf32> -> vector<4x16xf32>
    %219 = arith.truncf %218 : vector<4x16xf32> to vector<4x16xbf16>
    %c8_195 = arith.constant 8 : index
    %c0_196 = arith.constant 0 : index
    %c0_197 = arith.constant 0 : index
    %220 = vector.load %arg8[%c8_195, %c0_196, %c0_197] : memref<16x16x32xbf16, #tpu.memory_space<vmem>>, vector<1x16x32xbf16>
    %221 = vector.shape_cast %220 : vector<1x16x32xbf16> to vector<16x32xbf16>
    %cst_198 = arith.constant dense<0.000000e+00> : vector<4x32xf32>
    %222 = tpu.matmul %219, %221, %cst_198 {dimension_numbers = #tpu.dot_dimension_numbers<[1], [0], [0], [1], [0, 0, 1, 1], [], []>} : vector<4x16xbf16>, vector<16x32xbf16>, vector<4x32xf32> -> vector<4x32xf32>
    %223 = arith.addf %215, %222 : vector<4x32xf32>
    %c9_199 = arith.constant 9 : index
    %c0_200 = arith.constant 0 : index
    %c0_201 = arith.constant 0 : index
    %224 = vector.load %arg7[%c9_199, %c0_200, %c0_201] : memref<16x4x16xbf16, #tpu.memory_space<vmem>>, vector<1x4x16xbf16>
    %225 = vector.shape_cast %224 : vector<1x4x16xbf16> to vector<4x16xbf16>
    %cst_202 = arith.constant dense<0.000000e+00> : vector<4x16xf32>
    %226 = tpu.matmul %225, %150, %cst_202 {dimension_numbers = #tpu.dot_dimension_numbers<[1], [0], [0], [1], [0, 0, 1, 1], [], []>} : vector<4x16xbf16>, vector<16x16xbf16>, vector<4x16xf32> -> vector<4x16xf32>
    %227 = arith.truncf %226 : vector<4x16xf32> to vector<4x16xbf16>
    %c9_203 = arith.constant 9 : index
    %c0_204 = arith.constant 0 : index
    %c0_205 = arith.constant 0 : index
    %228 = vector.load %arg8[%c9_203, %c0_204, %c0_205] : memref<16x16x32xbf16, #tpu.memory_space<vmem>>, vector<1x16x32xbf16>
    %229 = vector.shape_cast %228 : vector<1x16x32xbf16> to vector<16x32xbf16>
    %cst_206 = arith.constant dense<0.000000e+00> : vector<4x32xf32>
    %230 = tpu.matmul %227, %229, %cst_206 {dimension_numbers = #tpu.dot_dimension_numbers<[1], [0], [0], [1], [0, 0, 1, 1], [], []>} : vector<4x16xbf16>, vector<16x32xbf16>, vector<4x32xf32> -> vector<4x32xf32>
    %231 = arith.addf %223, %230 : vector<4x32xf32>
    %c10_207 = arith.constant 10 : index
    %c0_208 = arith.constant 0 : index
    %c0_209 = arith.constant 0 : index
    %232 = vector.load %arg7[%c10_207, %c0_208, %c0_209] : memref<16x4x16xbf16, #tpu.memory_space<vmem>>, vector<1x4x16xbf16>
    %233 = vector.shape_cast %232 : vector<1x4x16xbf16> to vector<4x16xbf16>
    %cst_210 = arith.constant dense<0.000000e+00> : vector<4x16xf32>
    %234 = tpu.matmul %233, %150, %cst_210 {dimension_numbers = #tpu.dot_dimension_numbers<[1], [0], [0], [1], [0, 0, 1, 1], [], []>} : vector<4x16xbf16>, vector<16x16xbf16>, vector<4x16xf32> -> vector<4x16xf32>
    %235 = arith.truncf %234 : vector<4x16xf32> to vector<4x16xbf16>
    %c10_211 = arith.constant 10 : index
    %c0_212 = arith.constant 0 : index
    %c0_213 = arith.constant 0 : index
    %236 = vector.load %arg8[%c10_211, %c0_212, %c0_213] : memref<16x16x32xbf16, #tpu.memory_space<vmem>>, vector<1x16x32xbf16>
    %237 = vector.shape_cast %236 : vector<1x16x32xbf16> to vector<16x32xbf16>
    %cst_214 = arith.constant dense<0.000000e+00> : vector<4x32xf32>
    %238 = tpu.matmul %235, %237, %cst_214 {dimension_numbers = #tpu.dot_dimension_numbers<[1], [0], [0], [1], [0, 0, 1, 1], [], []>} : vector<4x16xbf16>, vector<16x32xbf16>, vector<4x32xf32> -> vector<4x32xf32>
    %239 = arith.addf %231, %238 : vector<4x32xf32>
    %c11_215 = arith.constant 11 : index
    %c0_216 = arith.constant 0 : index
    %c0_217 = arith.constant 0 : index
    %240 = vector.load %arg7[%c11_215, %c0_216, %c0_217] : memref<16x4x16xbf16, #tpu.memory_space<vmem>>, vector<1x4x16xbf16>
    %241 = vector.shape_cast %240 : vector<1x4x16xbf16> to vector<4x16xbf16>
    %cst_218 = arith.constant dense<0.000000e+00> : vector<4x16xf32>
    %242 = tpu.matmul %241, %150, %cst_218 {dimension_numbers = #tpu.dot_dimension_numbers<[1], [0], [0], [1], [0, 0, 1, 1], [], []>} : vector<4x16xbf16>, vector<16x16xbf16>, vector<4x16xf32> -> vector<4x16xf32>
    %243 = arith.truncf %242 : vector<4x16xf32> to vector<4x16xbf16>
    %c11_219 = arith.constant 11 : index
    %c0_220 = arith.constant 0 : index
    %c0_221 = arith.constant 0 : index
    %244 = vector.load %arg8[%c11_219, %c0_220, %c0_221] : memref<16x16x32xbf16, #tpu.memory_space<vmem>>, vector<1x16x32xbf16>
    %245 = vector.shape_cast %244 : vector<1x16x32xbf16> to vector<16x32xbf16>
    %cst_222 = arith.constant dense<0.000000e+00> : vector<4x32xf32>
    %246 = tpu.matmul %243, %245, %cst_222 {dimension_numbers = #tpu.dot_dimension_numbers<[1], [0], [0], [1], [0, 0, 1, 1], [], []>} : vector<4x16xbf16>, vector<16x32xbf16>, vector<4x32xf32> -> vector<4x32xf32>
    %247 = arith.addf %239, %246 : vector<4x32xf32>
    %c12_223 = arith.constant 12 : index
    %c0_224 = arith.constant 0 : index
    %c0_225 = arith.constant 0 : index
    %248 = vector.load %arg7[%c12_223, %c0_224, %c0_225] : memref<16x4x16xbf16, #tpu.memory_space<vmem>>, vector<1x4x16xbf16>
    %249 = vector.shape_cast %248 : vector<1x4x16xbf16> to vector<4x16xbf16>
    %cst_226 = arith.constant dense<0.000000e+00> : vector<4x16xf32>
    %250 = tpu.matmul %249, %150, %cst_226 {dimension_numbers = #tpu.dot_dimension_numbers<[1], [0], [0], [1], [0, 0, 1, 1], [], []>} : vector<4x16xbf16>, vector<16x16xbf16>, vector<4x16xf32> -> vector<4x16xf32>
    %251 = arith.truncf %250 : vector<4x16xf32> to vector<4x16xbf16>
    %c12_227 = arith.constant 12 : index
    %c0_228 = arith.constant 0 : index
    %c0_229 = arith.constant 0 : index
    %252 = vector.load %arg8[%c12_227, %c0_228, %c0_229] : memref<16x16x32xbf16, #tpu.memory_space<vmem>>, vector<1x16x32xbf16>
    %253 = vector.shape_cast %252 : vector<1x16x32xbf16> to vector<16x32xbf16>
    %cst_230 = arith.constant dense<0.000000e+00> : vector<4x32xf32>
    %254 = tpu.matmul %251, %253, %cst_230 {dimension_numbers = #tpu.dot_dimension_numbers<[1], [0], [0], [1], [0, 0, 1, 1], [], []>} : vector<4x16xbf16>, vector<16x32xbf16>, vector<4x32xf32> -> vector<4x32xf32>
    %255 = arith.addf %247, %254 : vector<4x32xf32>
    %c13_231 = arith.constant 13 : index
    %c0_232 = arith.constant 0 : index
    %c0_233 = arith.constant 0 : index
    %256 = vector.load %arg7[%c13_231, %c0_232, %c0_233] : memref<16x4x16xbf16, #tpu.memory_space<vmem>>, vector<1x4x16xbf16>
    %257 = vector.shape_cast %256 : vector<1x4x16xbf16> to vector<4x16xbf16>
    %cst_234 = arith.constant dense<0.000000e+00> : vector<4x16xf32>
    %258 = tpu.matmul %257, %150, %cst_234 {dimension_numbers = #tpu.dot_dimension_numbers<[1], [0], [0], [1], [0, 0, 1, 1], [], []>} : vector<4x16xbf16>, vector<16x16xbf16>, vector<4x16xf32> -> vector<4x16xf32>
    %259 = arith.truncf %258 : vector<4x16xf32> to vector<4x16xbf16>
    %c13_235 = arith.constant 13 : index
    %c0_236 = arith.constant 0 : index
    %c0_237 = arith.constant 0 : index
    %260 = vector.load %arg8[%c13_235, %c0_236, %c0_237] : memref<16x16x32xbf16, #tpu.memory_space<vmem>>, vector<1x16x32xbf16>
    %261 = vector.shape_cast %260 : vector<1x16x32xbf16> to vector<16x32xbf16>
    %cst_238 = arith.constant dense<0.000000e+00> : vector<4x32xf32>
    %262 = tpu.matmul %259, %261, %cst_238 {dimension_numbers = #tpu.dot_dimension_numbers<[1], [0], [0], [1], [0, 0, 1, 1], [], []>} : vector<4x16xbf16>, vector<16x32xbf16>, vector<4x32xf32> -> vector<4x32xf32>
    %263 = arith.addf %255, %262 : vector<4x32xf32>
    %c14_239 = arith.constant 14 : index
    %c0_240 = arith.constant 0 : index
    %c0_241 = arith.constant 0 : index
    %264 = vector.load %arg7[%c14_239, %c0_240, %c0_241] : memref<16x4x16xbf16, #tpu.memory_space<vmem>>, vector<1x4x16xbf16>
    %265 = vector.shape_cast %264 : vector<1x4x16xbf16> to vector<4x16xbf16>
    %cst_242 = arith.constant dense<0.000000e+00> : vector<4x16xf32>
    %266 = tpu.matmul %265, %150, %cst_242 {dimension_numbers = #tpu.dot_dimension_numbers<[1], [0], [0], [1], [0, 0, 1, 1], [], []>} : vector<4x16xbf16>, vector<16x16xbf16>, vector<4x16xf32> -> vector<4x16xf32>
    %267 = arith.truncf %266 : vector<4x16xf32> to vector<4x16xbf16>
    %c14_243 = arith.constant 14 : index
    %c0_244 = arith.constant 0 : index
    %c0_245 = arith.constant 0 : index
    %268 = vector.load %arg8[%c14_243, %c0_244, %c0_245] : memref<16x16x32xbf16, #tpu.memory_space<vmem>>, vector<1x16x32xbf16>
    %269 = vector.shape_cast %268 : vector<1x16x32xbf16> to vector<16x32xbf16>
    %cst_246 = arith.constant dense<0.000000e+00> : vector<4x32xf32>
    %270 = tpu.matmul %267, %269, %cst_246 {dimension_numbers = #tpu.dot_dimension_numbers<[1], [0], [0], [1], [0, 0, 1, 1], [], []>} : vector<4x16xbf16>, vector<16x32xbf16>, vector<4x32xf32> -> vector<4x32xf32>
    %271 = arith.addf %263, %270 : vector<4x32xf32>
    %c15_247 = arith.constant 15 : index
    %c0_248 = arith.constant 0 : index
    %c0_249 = arith.constant 0 : index
    %272 = vector.load %arg7[%c15_247, %c0_248, %c0_249] : memref<16x4x16xbf16, #tpu.memory_space<vmem>>, vector<1x4x16xbf16>
    %273 = vector.shape_cast %272 : vector<1x4x16xbf16> to vector<4x16xbf16>
    %cst_250 = arith.constant dense<0.000000e+00> : vector<4x16xf32>
    %274 = tpu.matmul %273, %150, %cst_250 {dimension_numbers = #tpu.dot_dimension_numbers<[1], [0], [0], [1], [0, 0, 1, 1], [], []>} : vector<4x16xbf16>, vector<16x16xbf16>, vector<4x16xf32> -> vector<4x16xf32>
    %275 = arith.truncf %274 : vector<4x16xf32> to vector<4x16xbf16>
    %c15_251 = arith.constant 15 : index
    %c0_252 = arith.constant 0 : index
    %c0_253 = arith.constant 0 : index
    %276 = vector.load %arg8[%c15_251, %c0_252, %c0_253] : memref<16x16x32xbf16, #tpu.memory_space<vmem>>, vector<1x16x32xbf16>
    %277 = vector.shape_cast %276 : vector<1x16x32xbf16> to vector<16x32xbf16>
    %cst_254 = arith.constant dense<0.000000e+00> : vector<4x32xf32>
    %278 = tpu.matmul %275, %277, %cst_254 {dimension_numbers = #tpu.dot_dimension_numbers<[1], [0], [0], [1], [0, 0, 1, 1], [], []>} : vector<4x16xbf16>, vector<16x32xbf16>, vector<4x32xf32> -> vector<4x32xf32>
    %279 = arith.addf %271, %278 : vector<4x32xf32>
    %c0_255 = arith.constant 0 : index
    %c0_256 = arith.constant 0 : index
    %280 = vector.load %arg9[%c0_255, %c0_256] : memref<1x32xf32, #tpu.memory_space<vmem>>, vector<1x32xf32>
    %281 = vector.broadcast %280 : vector<1x32xf32> to vector<4x32xf32>
    %282 = arith.addf %279, %281 : vector<4x32xf32>
    %cst_257 = arith.constant 0.000000e+00 : f32
    %283 = vector.broadcast %cst_257 : f32 to vector<4x32xf32>
    %284 = arith.cmpf oge, %282, %283 : vector<4x32xf32>
    %cst_258 = arith.constant 0.00999999977 : f32
    %285 = vector.broadcast %cst_258 : f32 to vector<4x32xf32>
    %286 = arith.mulf %285, %282 : vector<4x32xf32>
    %287 = arith.select %284, %282, %286 : vector<4x32xi1>, vector<4x32xf32>
    %288 = arith.truncf %287 : vector<4x32xf32> to vector<4x32xbf16>
    %cst_259 = arith.constant 0.000000e+00 : f32
    %289 = vector.broadcast %cst_259 : f32 to vector<4x1xf32>
    %c0_260 = arith.constant 0 : index
    %c0_261 = arith.constant 0 : index
    %c0_262 = arith.constant 0 : index
    %290 = vector.load %arg10[%c0_260, %c0_261, %c0_262] : memref<9x4x4xbf16, #tpu.memory_space<vmem>>, vector<1x4x4xbf16>
    %291 = vector.shape_cast %290 : vector<1x4x4xbf16> to vector<4x4xbf16>
    %cst_263 = arith.constant dense<0.000000e+00> : vector<4x32xf32>
    %292 = tpu.matmul %291, %288, %cst_263 {dimension_numbers = #tpu.dot_dimension_numbers<[1], [0], [0], [1], [0, 0, 1, 1], [], []>} : vector<4x4xbf16>, vector<4x32xbf16>, vector<4x32xf32> -> vector<4x32xf32>
    %293 = arith.truncf %292 : vector<4x32xf32> to vector<4x32xbf16>
    %c0_264 = arith.constant 0 : index
    %c0_265 = arith.constant 0 : index
    %c0_266 = arith.constant 0 : index
    %294 = vector.load %arg11[%c0_264, %c0_265, %c0_266] : memref<9x32x1xbf16, #tpu.memory_space<vmem>>, vector<1x32x1xbf16>
    %295 = vector.shape_cast %294 : vector<1x32x1xbf16> to vector<32x1xbf16>
    %cst_267 = arith.constant dense<0.000000e+00> : vector<4x1xf32>
    %296 = tpu.matmul %293, %295, %cst_267 {dimension_numbers = #tpu.dot_dimension_numbers<[1], [0], [0], [1], [0, 0, 1, 1], [], []>} : vector<4x32xbf16>, vector<32x1xbf16>, vector<4x1xf32> -> vector<4x1xf32>
    %297 = arith.addf %289, %296 : vector<4x1xf32>
    %c1_268 = arith.constant 1 : index
    %c0_269 = arith.constant 0 : index
    %c0_270 = arith.constant 0 : index
    %298 = vector.load %arg10[%c1_268, %c0_269, %c0_270] : memref<9x4x4xbf16, #tpu.memory_space<vmem>>, vector<1x4x4xbf16>
    %299 = vector.shape_cast %298 : vector<1x4x4xbf16> to vector<4x4xbf16>
    %cst_271 = arith.constant dense<0.000000e+00> : vector<4x32xf32>
    %300 = tpu.matmul %299, %288, %cst_271 {dimension_numbers = #tpu.dot_dimension_numbers<[1], [0], [0], [1], [0, 0, 1, 1], [], []>} : vector<4x4xbf16>, vector<4x32xbf16>, vector<4x32xf32> -> vector<4x32xf32>
    %301 = arith.truncf %300 : vector<4x32xf32> to vector<4x32xbf16>
    %c1_272 = arith.constant 1 : index
    %c0_273 = arith.constant 0 : index
    %c0_274 = arith.constant 0 : index
    %302 = vector.load %arg11[%c1_272, %c0_273, %c0_274] : memref<9x32x1xbf16, #tpu.memory_space<vmem>>, vector<1x32x1xbf16>
    %303 = vector.shape_cast %302 : vector<1x32x1xbf16> to vector<32x1xbf16>
    %cst_275 = arith.constant dense<0.000000e+00> : vector<4x1xf32>
    %304 = tpu.matmul %301, %303, %cst_275 {dimension_numbers = #tpu.dot_dimension_numbers<[1], [0], [0], [1], [0, 0, 1, 1], [], []>} : vector<4x32xbf16>, vector<32x1xbf16>, vector<4x1xf32> -> vector<4x1xf32>
    %305 = arith.addf %297, %304 : vector<4x1xf32>
    %c2_276 = arith.constant 2 : index
    %c0_277 = arith.constant 0 : index
    %c0_278 = arith.constant 0 : index
    %306 = vector.load %arg10[%c2_276, %c0_277, %c0_278] : memref<9x4x4xbf16, #tpu.memory_space<vmem>>, vector<1x4x4xbf16>
    %307 = vector.shape_cast %306 : vector<1x4x4xbf16> to vector<4x4xbf16>
    %cst_279 = arith.constant dense<0.000000e+00> : vector<4x32xf32>
    %308 = tpu.matmul %307, %288, %cst_279 {dimension_numbers = #tpu.dot_dimension_numbers<[1], [0], [0], [1], [0, 0, 1, 1], [], []>} : vector<4x4xbf16>, vector<4x32xbf16>, vector<4x32xf32> -> vector<4x32xf32>
    %309 = arith.truncf %308 : vector<4x32xf32> to vector<4x32xbf16>
    %c2_280 = arith.constant 2 : index
    %c0_281 = arith.constant 0 : index
    %c0_282 = arith.constant 0 : index
    %310 = vector.load %arg11[%c2_280, %c0_281, %c0_282] : memref<9x32x1xbf16, #tpu.memory_space<vmem>>, vector<1x32x1xbf16>
    %311 = vector.shape_cast %310 : vector<1x32x1xbf16> to vector<32x1xbf16>
    %cst_283 = arith.constant dense<0.000000e+00> : vector<4x1xf32>
    %312 = tpu.matmul %309, %311, %cst_283 {dimension_numbers = #tpu.dot_dimension_numbers<[1], [0], [0], [1], [0, 0, 1, 1], [], []>} : vector<4x32xbf16>, vector<32x1xbf16>, vector<4x1xf32> -> vector<4x1xf32>
    %313 = arith.addf %305, %312 : vector<4x1xf32>
    %c3_284 = arith.constant 3 : index
    %c0_285 = arith.constant 0 : index
    %c0_286 = arith.constant 0 : index
    %314 = vector.load %arg10[%c3_284, %c0_285, %c0_286] : memref<9x4x4xbf16, #tpu.memory_space<vmem>>, vector<1x4x4xbf16>
    %315 = vector.shape_cast %314 : vector<1x4x4xbf16> to vector<4x4xbf16>
    %cst_287 = arith.constant dense<0.000000e+00> : vector<4x32xf32>
    %316 = tpu.matmul %315, %288, %cst_287 {dimension_numbers = #tpu.dot_dimension_numbers<[1], [0], [0], [1], [0, 0, 1, 1], [], []>} : vector<4x4xbf16>, vector<4x32xbf16>, vector<4x32xf32> -> vector<4x32xf32>
    %317 = arith.truncf %316 : vector<4x32xf32> to vector<4x32xbf16>
    %c3_288 = arith.constant 3 : index
    %c0_289 = arith.constant 0 : index
    %c0_290 = arith.constant 0 : index
    %318 = vector.load %arg11[%c3_288, %c0_289, %c0_290] : memref<9x32x1xbf16, #tpu.memory_space<vmem>>, vector<1x32x1xbf16>
    %319 = vector.shape_cast %318 : vector<1x32x1xbf16> to vector<32x1xbf16>
    %cst_291 = arith.constant dense<0.000000e+00> : vector<4x1xf32>
    %320 = tpu.matmul %317, %319, %cst_291 {dimension_numbers = #tpu.dot_dimension_numbers<[1], [0], [0], [1], [0, 0, 1, 1], [], []>} : vector<4x32xbf16>, vector<32x1xbf16>, vector<4x1xf32> -> vector<4x1xf32>
    %321 = arith.addf %313, %320 : vector<4x1xf32>
    %c4_292 = arith.constant 4 : index
    %c0_293 = arith.constant 0 : index
    %c0_294 = arith.constant 0 : index
    %322 = vector.load %arg10[%c4_292, %c0_293, %c0_294] : memref<9x4x4xbf16, #tpu.memory_space<vmem>>, vector<1x4x4xbf16>
    %323 = vector.shape_cast %322 : vector<1x4x4xbf16> to vector<4x4xbf16>
    %cst_295 = arith.constant dense<0.000000e+00> : vector<4x32xf32>
    %324 = tpu.matmul %323, %288, %cst_295 {dimension_numbers = #tpu.dot_dimension_numbers<[1], [0], [0], [1], [0, 0, 1, 1], [], []>} : vector<4x4xbf16>, vector<4x32xbf16>, vector<4x32xf32> -> vector<4x32xf32>
    %325 = arith.truncf %324 : vector<4x32xf32> to vector<4x32xbf16>
    %c4_296 = arith.constant 4 : index
    %c0_297 = arith.constant 0 : index
    %c0_298 = arith.constant 0 : index
    %326 = vector.load %arg11[%c4_296, %c0_297, %c0_298] : memref<9x32x1xbf16, #tpu.memory_space<vmem>>, vector<1x32x1xbf16>
    %327 = vector.shape_cast %326 : vector<1x32x1xbf16> to vector<32x1xbf16>
    %cst_299 = arith.constant dense<0.000000e+00> : vector<4x1xf32>
    %328 = tpu.matmul %325, %327, %cst_299 {dimension_numbers = #tpu.dot_dimension_numbers<[1], [0], [0], [1], [0, 0, 1, 1], [], []>} : vector<4x32xbf16>, vector<32x1xbf16>, vector<4x1xf32> -> vector<4x1xf32>
    %329 = arith.addf %321, %328 : vector<4x1xf32>
    %c5_300 = arith.constant 5 : index
    %c0_301 = arith.constant 0 : index
    %c0_302 = arith.constant 0 : index
    %330 = vector.load %arg10[%c5_300, %c0_301, %c0_302] : memref<9x4x4xbf16, #tpu.memory_space<vmem>>, vector<1x4x4xbf16>
    %331 = vector.shape_cast %330 : vector<1x4x4xbf16> to vector<4x4xbf16>
    %cst_303 = arith.constant dense<0.000000e+00> : vector<4x32xf32>
    %332 = tpu.matmul %331, %288, %cst_303 {dimension_numbers = #tpu.dot_dimension_numbers<[1], [0], [0], [1], [0, 0, 1, 1], [], []>} : vector<4x4xbf16>, vector<4x32xbf16>, vector<4x32xf32> -> vector<4x32xf32>
    %333 = arith.truncf %332 : vector<4x32xf32> to vector<4x32xbf16>
    %c5_304 = arith.constant 5 : index
    %c0_305 = arith.constant 0 : index
    %c0_306 = arith.constant 0 : index
    %334 = vector.load %arg11[%c5_304, %c0_305, %c0_306] : memref<9x32x1xbf16, #tpu.memory_space<vmem>>, vector<1x32x1xbf16>
    %335 = vector.shape_cast %334 : vector<1x32x1xbf16> to vector<32x1xbf16>
    %cst_307 = arith.constant dense<0.000000e+00> : vector<4x1xf32>
    %336 = tpu.matmul %333, %335, %cst_307 {dimension_numbers = #tpu.dot_dimension_numbers<[1], [0], [0], [1], [0, 0, 1, 1], [], []>} : vector<4x32xbf16>, vector<32x1xbf16>, vector<4x1xf32> -> vector<4x1xf32>
    %337 = arith.addf %329, %336 : vector<4x1xf32>
    %c6_308 = arith.constant 6 : index
    %c0_309 = arith.constant 0 : index
    %c0_310 = arith.constant 0 : index
    %338 = vector.load %arg10[%c6_308, %c0_309, %c0_310] : memref<9x4x4xbf16, #tpu.memory_space<vmem>>, vector<1x4x4xbf16>
    %339 = vector.shape_cast %338 : vector<1x4x4xbf16> to vector<4x4xbf16>
    %cst_311 = arith.constant dense<0.000000e+00> : vector<4x32xf32>
    %340 = tpu.matmul %339, %288, %cst_311 {dimension_numbers = #tpu.dot_dimension_numbers<[1], [0], [0], [1], [0, 0, 1, 1], [], []>} : vector<4x4xbf16>, vector<4x32xbf16>, vector<4x32xf32> -> vector<4x32xf32>
    %341 = arith.truncf %340 : vector<4x32xf32> to vector<4x32xbf16>
    %c6_312 = arith.constant 6 : index
    %c0_313 = arith.constant 0 : index
    %c0_314 = arith.constant 0 : index
    %342 = vector.load %arg11[%c6_312, %c0_313, %c0_314] : memref<9x32x1xbf16, #tpu.memory_space<vmem>>, vector<1x32x1xbf16>
    %343 = vector.shape_cast %342 : vector<1x32x1xbf16> to vector<32x1xbf16>
    %cst_315 = arith.constant dense<0.000000e+00> : vector<4x1xf32>
    %344 = tpu.matmul %341, %343, %cst_315 {dimension_numbers = #tpu.dot_dimension_numbers<[1], [0], [0], [1], [0, 0, 1, 1], [], []>} : vector<4x32xbf16>, vector<32x1xbf16>, vector<4x1xf32> -> vector<4x1xf32>
    %345 = arith.addf %337, %344 : vector<4x1xf32>
    %c7_316 = arith.constant 7 : index
    %c0_317 = arith.constant 0 : index
    %c0_318 = arith.constant 0 : index
    %346 = vector.load %arg10[%c7_316, %c0_317, %c0_318] : memref<9x4x4xbf16, #tpu.memory_space<vmem>>, vector<1x4x4xbf16>
    %347 = vector.shape_cast %346 : vector<1x4x4xbf16> to vector<4x4xbf16>
    %cst_319 = arith.constant dense<0.000000e+00> : vector<4x32xf32>
    %348 = tpu.matmul %347, %288, %cst_319 {dimension_numbers = #tpu.dot_dimension_numbers<[1], [0], [0], [1], [0, 0, 1, 1], [], []>} : vector<4x4xbf16>, vector<4x32xbf16>, vector<4x32xf32> -> vector<4x32xf32>
    %349 = arith.truncf %348 : vector<4x32xf32> to vector<4x32xbf16>
    %c7_320 = arith.constant 7 : index
    %c0_321 = arith.constant 0 : index
    %c0_322 = arith.constant 0 : index
    %350 = vector.load %arg11[%c7_320, %c0_321, %c0_322] : memref<9x32x1xbf16, #tpu.memory_space<vmem>>, vector<1x32x1xbf16>
    %351 = vector.shape_cast %350 : vector<1x32x1xbf16> to vector<32x1xbf16>
    %cst_323 = arith.constant dense<0.000000e+00> : vector<4x1xf32>
    %352 = tpu.matmul %349, %351, %cst_323 {dimension_numbers = #tpu.dot_dimension_numbers<[1], [0], [0], [1], [0, 0, 1, 1], [], []>} : vector<4x32xbf16>, vector<32x1xbf16>, vector<4x1xf32> -> vector<4x1xf32>
    %353 = arith.addf %345, %352 : vector<4x1xf32>
    %c8_324 = arith.constant 8 : index
    %c0_325 = arith.constant 0 : index
    %c0_326 = arith.constant 0 : index
    %354 = vector.load %arg10[%c8_324, %c0_325, %c0_326] : memref<9x4x4xbf16, #tpu.memory_space<vmem>>, vector<1x4x4xbf16>
    %355 = vector.shape_cast %354 : vector<1x4x4xbf16> to vector<4x4xbf16>
    %cst_327 = arith.constant dense<0.000000e+00> : vector<4x32xf32>
    %356 = tpu.matmul %355, %288, %cst_327 {dimension_numbers = #tpu.dot_dimension_numbers<[1], [0], [0], [1], [0, 0, 1, 1], [], []>} : vector<4x4xbf16>, vector<4x32xbf16>, vector<4x32xf32> -> vector<4x32xf32>
    %357 = arith.truncf %356 : vector<4x32xf32> to vector<4x32xbf16>
    %c8_328 = arith.constant 8 : index
    %c0_329 = arith.constant 0 : index
    %c0_330 = arith.constant 0 : index
    %358 = vector.load %arg11[%c8_328, %c0_329, %c0_330] : memref<9x32x1xbf16, #tpu.memory_space<vmem>>, vector<1x32x1xbf16>
    %359 = vector.shape_cast %358 : vector<1x32x1xbf16> to vector<32x1xbf16>
    %cst_331 = arith.constant dense<0.000000e+00> : vector<4x1xf32>
    %360 = tpu.matmul %357, %359, %cst_331 {dimension_numbers = #tpu.dot_dimension_numbers<[1], [0], [0], [1], [0, 0, 1, 1], [], []>} : vector<4x32xbf16>, vector<32x1xbf16>, vector<4x1xf32> -> vector<4x1xf32>
    %361 = arith.addf %353, %360 : vector<4x1xf32>
    %c0_332 = arith.constant 0 : index
    %c0_333 = arith.constant 0 : index
    %c0_334 = arith.constant 0 : index
    %362 = vector.load %arg12[%c0_332, %c0_333, %c0_334] : memref<1x4x1xf32, #tpu.memory_space<vmem>>, vector<1x4x1xf32>
    %363 = vector.shape_cast %362 : vector<1x4x1xf32> to vector<4x1xf32>
    %364 = vector.shape_cast %361 : vector<4x1xf32> to vector<1x4x1xf32>
    tpu.vector_store %arg12[%c0_332, %c0_333, %c0_334], %364 {strides = array<i32>} : memref<1x4x1xf32, #tpu.memory_space<vmem>>, vector<1x4x1xf32>,
    return
  }
  func.func @transform_0(%arg0: i32) -> (i32, i32, i32) {
    %c0_i32 = arith.constant 0 : i32
    %c0_i32_0 = arith.constant 0 : i32
    %c0_i32_1 = arith.constant 0 : i32
    return %arg0, %c0_i32, %c0_i32_0 : i32, i32, i32
  }
  func.func @transform_1(%arg0: i32) -> (i32, i32) {
    %c0_i32 = arith.constant 0 : i32
    %c0_i32_0 = arith.constant 0 : i32
    %c0_i32_1 = arith.constant 0 : i32
    return %c0_i32, %c0_i32_0 : i32, i32
  }
  func.func @transform_2(%arg0: i32) -> (i32, i32) {
    %c0_i32 = arith.constant 0 : i32
    %c0_i32_0 = arith.constant 0 : i32
    %c0_i32_1 = arith.constant 0 : i32
    return %c0_i32, %c0_i32_0 : i32, i32
  }
  func.func @transform_3(%arg0: i32) -> (i32, i32, i32) {
    %c0_i32 = arith.constant 0 : i32
    %c0_i32_0 = arith.constant 0 : i32
    %c0_i32_1 = arith.constant 0 : i32
    %c0_i32_2 = arith.constant 0 : i32
    return %c0_i32, %c0_i32_0, %c0_i32_1 : i32, i32, i32
  }
  func.func @transform_4(%arg0: i32) -> (i32, i32, i32) {
    %c0_i32 = arith.constant 0 : i32
    %c0_i32_0 = arith.constant 0 : i32
    %c0_i32_1 = arith.constant 0 : i32
    %c0_i32_2 = arith.constant 0 : i32
    return %c0_i32, %c0_i32_0, %c0_i32_1 : i32, i32, i32
  }
  func.func @transform_5(%arg0: i32) -> (i32, i32) {
    %c0_i32 = arith.constant 0 : i32
    %c0_i32_0 = arith.constant 0 : i32
    %c0_i32_1 = arith.constant 0 : i32
    return %c0_i32, %c0_i32_0 : i32, i32
  }
  func.func @transform_6(%arg0: i32) -> (i32, i32, i32) {
    %c0_i32 = arith.constant 0 : i32
    %c0_i32_0 = arith.constant 0 : i32
    %c0_i32_1 = arith.constant 0 : i32
    %c0_i32_2 = arith.constant 0 : i32
    return %c0_i32, %c0_i32_0, %c0_i32_1 : i32, i32, i32
  }
  func.func @transform_7(%arg0: i32) -> (i32, i32, i32) {
    %c0_i32 = arith.constant 0 : i32
    %c0_i32_0 = arith.constant 0 : i32
    %c0_i32_1 = arith.constant 0 : i32
    %c0_i32_2 = arith.constant 0 : i32
    return %c0_i32, %c0_i32_0, %c0_i32_1 : i32, i32, i32
  }
  func.func @transform_8(%arg0: i32) -> (i32, i32) {
    %c0_i32 = arith.constant 0 : i32
    %c0_i32_0 = arith.constant 0 : i32
    %c0_i32_1 = arith.constant 0 : i32
    return %c0_i32, %c0_i32_0 : i32, i32
  }
  func.func @transform_9(%arg0: i32) -> (i32, i32, i32) {
    %c0_i32 = arith.constant 0 : i32
    %c0_i32_0 = arith.constant 0 : i32
    %c0_i32_1 = arith.constant 0 : i32
    %c0_i32_2 = arith.constant 0 : i32
    return %c0_i32, %c0_i32_0, %c0_i32_1 : i32, i32, i32
  }
  func.func @transform_10(%arg0: i32) -> (i32, i32, i32) {
    %c0_i32 = arith.constant 0 : i32
    %c0_i32_0 = arith.constant 0 : i32
    %c0_i32_1 = arith.constant 0 : i32
    %c0_i32_2 = arith.constant 0 : i32
    return %c0_i32, %c0_i32_0, %c0_i32_1 : i32, i32, i32
  }
  func.func @transform_11(%arg0: i32) -> (i32, i32, i32) {
    %c0_i32 = arith.constant 0 : i32
    %c0_i32_0 = arith.constant 0 : i32
    %c0_i32_1 = arith.constant 0 : i32
    return %arg0, %c0_i32, %c0_i32_0 : i32, i32, i32
  }
}

</mosaic_0001>

<bundles_post_ra>
// kernel: _fused_forward.1
= control target key start
LH: loop header
LB: loop body
LE: loop exit
PB: predicated region body
PF: predicated region fallthrough
CT: control target
= control target key end

     0   :  { %s3173_s17 = smov 0   ;;  %s3679_s0 = inlined_call_operand.vmem [shape: bf16[2,64,48], index: 0, kind: input, shape index: {}]   ;;  %s3680_s1 = inlined_call_operand.vmem [shape: bf16[48,8], index: 1, kind: input, shape index: {}]   ;;  %s3681_s2 = inlined_call_operand.vmem [shape: f32[1,8], index: 2, kind: input, shape index: {}]   ;;  %s3682_s3 = inlined_call_operand.vmem [shape: bf16[16,16,64], index: 3, kind: input, shape index: {}]   ;;  %s3683_s4 = inlined_call_operand.vmem [shape: bf16[16,8,16], index: 4, kind: input, shape index: {}]   ;;  %s3684_s5 = inlined_call_operand.vmem [shape: f32[1,16], index: 5, kind: input, shape index: {}]   ;;  %s3685_s6 = inlined_call_operand.vmem [shape: bf16[16,4,16], index: 6, kind: input, shape index: {}]   ;;  %s3686_s7 = inlined_call_operand.vmem [shape: bf16[16,16,32], index: 7, kind: input, shape index: {}]   ;;  %s3687_s8 = inlined_call_operand.vmem [shape: f32[1,32], index: 8, kind: input, shape index: {}]   ;;  %s3688_s9 = inlined_call_operand.vmem [shape: bf16[9,4,4], index: 9, kind: input, shape index: {}]   ;;  %s3689_s10 = inlined_call_operand.vmem [shape: bf16[9,32,1], index: 10, kind: input, shape index: {}]   ;;  %s3690_s11 = inlined_call_operand.vmem [shape: f32[2,4,1], index: 11, kind: output, shape index: {}]  }
   0x1 LB: > { %s2582_s18 = sadd.s32 4294967295, %s3111_s17   ;;  %p2586_p0 = scmp.ge.s32.totalorder %s3111_s17, 1  ;;  %s3111_s17 = sphi %s3173_s17, %s21_s17  }
   0x2   : > { %p337_p1 = scmp.lt.s32.totalorder %s3111_s17, 3 }
   0x4   : > { %p338_p2 = pnand %p2586_p0, %p337_p1 }
   0x5   : > { %p376_p3 = scmp.lt.s32.totalorder (!%p338_p2), %s2582_s18, 1 }
   0x6   : > { %341 = sbr.rel (%p338_p2) target bundleno = 1884 (0x75c), region = 64 }
   0xb   : > { %v3043_v0 = vld [vmem:[%s3680_s1 + $0x10] sm:$0xff]  ;;  %v3042_v1 = vld [vmem:[%s3680_s1 + $0x8] sm:$0xff]  ;;  %s3692_s18 = smov (!%p376_p3, %s2582_s18), 1  ;;  %v3041_v2 = vld [vmem:[%s3680_s1] sm:$0xff]  ;;  %vm442_vm0 = vcmask 392192   ;;  %vm571_vm9 = vcmask 1043456  }
   0xc   : > { %460 = vmatpush.bf16.msra.mxu0 %v3043_v0  ;;  %s3036_s23 = sshll.u32 %s3692_s18, 5  ;;  %v3102_v14 = vld [vmem:[%s3681_s2] ss:$0 sm:$0xff]  ;;  %v2644_v42 = vld [vmem:[%s3683_s4 + $0x8] sm:$0xf]  ;;  %vm519_vm10 = vcmask 523264  }
   0xd   : > { %s380_s28 = scalar_lea.vmem %s3679_s0, %s3036_s23  ;;  %v641_v45 = vsel %vm571_vm9, %v2644_v42, 0  ;;  %v3044_v46 = vld [vmem:[%s3682_s3] sm:$0xff]  ;;  %v3045_v47 = vld [vmem:[%s3682_s3 + $0x8] sm:$0xff]  ;;  %v3046_v50 = vld [vmem:[%s3682_s3 + $0x10] sm:$0xff]  ;;  %vm567_vm11 = vcmask 64512   ;;  %vm1323_vm14 = vcmask 130048  }
   0xe   : > { %v3037_v3 = vld [vmem:[%s380_s28] sm:$0xff]  ;;  %v3038_v4 = vld [vmem:[%s380_s28 + $0x8] sm:$0xff]  ;;  %v3039_v5 = vld [vmem:[%s380_s28 + $0x10] sm:$0xff]  ;;  %s2589_s30 = sshll.u32 %s3692_s18, 2 }
   0xf   : > { %v3040_v6 = vld [vmem:[%s380_s28 + $0x18] sm:$0xff]  ;;  %v2653_v48 = vld [vmem:[%s3683_s4 + $0xc] sm:$0xf]  ;;  %v2634_v51 = vld [vmem:[%s3683_s4 + $0x4] sm:$0xf]  ;;  %s384_s14 = scalar_lea.vmem %s3690_s11, %s2589_s30 }
  0x10   : > { %461 = vmatpush.bf16.msra.mxu0 %v3042_v1  ;;  %v691_v49 = vsel %vm571_vm9, %v2653_v48, 0  ;;  %v573_v52 = vsel %vm571_vm9, %v2634_v51, 0  ;;  %v538_v53 = vld [vmem:[%s3683_s4] sm:$0xf]  ;;  %v2662_v63 = vld [vmem:[%s3683_s4 + $0x10] sm:$0xf] }
  0x11   : > { %582 = vmatpush.bf16.msra.mxu3 %v573_v52  ;;  %v593_v54 = vsel %vm571_vm9, %v538_v53, 0  ;;  %v741_v1 = vsel %vm571_vm9, %v2662_v63, 0  ;;  %v2716_v51 = vld [vmem:[%s3683_s4 + $0x28] sm:$0xf] }
  0x12   : > { %v1041_v52 = vsel %vm571_vm9, %v2716_v51, 0 }
  0x14   : > { %462 = vmatpush.bf16.msra.mxu0 %v3041_v2  ;;  %v3048_v2 = vld [vmem:[%s3682_s3 + $0x20] sm:$0xff] }
  0x15   : > { %602 = vmatpush.bf16.msrb.mxu3 %v593_v54 }
  0x17   : > { %2618 = vmatmul.msk.bf16.vlgmr.msra.gmra.mxu0 %vm442_vm0, %v3037_v3  ;;  %v3047_v3 = vld [vmem:[%s3682_s3 + $0x18] sm:$0xff] }
  0x27   : > { %2619 = vmatmul.msk.bf16.gmra.mxu0 %vm442_vm0, %v3038_v4 }
  0x37   : > { %2620 = vmatmul.msk.bf16.gmra.mxu0 %vm442_vm0, %v3039_v5 }
  0x47   : > { %2621 = vmatmul.msk.bf16.gmra.mxu0 %vm442_vm0, %v3040_v6  ;;  %vm2053_vm0 = vcmask 1041408  }
  0x94   : > { %v464_v7 = vpop.f32.mrf.mxu0 }
  0x95   : > { %v465_v32 = vadd.f32 %v3102_v14, %v464_v7 }
  0x97   : > { %v492_v38 = vmul.f32 0.01, %v465_v32  ;;  %vm484_vm8 = vcmp.ge.f32.partialorder %v465_v32, 0.0 }
  0x99   : > { %v500_v43 = vsel %vm484_vm8, %v465_v32, %v492_v38 }
  0x9c   : > { %v466_v8 = vpop.f32.mrf.mxu0 }
  0x9d   : > { %v467_v29 = vadd.f32 %v3102_v14, %v466_v8 }
  0x9f   : > { %v493_v36 = vmul.f32 0.01, %v467_v29  ;;  %vm485_vm7 = vcmp.ge.f32.partialorder %v467_v29, 0.0 }
  0xa1   : > { %v501_v41 = vsel %vm485_vm7, %v467_v29, %v493_v36  ;;  %v3058_v29 = vld [vmem:[%s3682_s3 + $0x70] sm:$0xff] }
  0xa2   : > { %v3214_v44 = vpack.c.bf16 %v501_v41, %v500_v43  ;;  %v2698_v41 = vld [vmem:[%s3683_s4 + $0x20] sm:$0xf] }
  0xa3   : > { %v941_v42 = vsel %vm571_vm9, %v2698_v41, 0 }
  0xa4   : > { %v469_v9 = vpop.f32.mrf.mxu0 }
  0xa5   : > { %v470_v24 = vadd.f32 %v3102_v14, %v469_v9 }
  0xa7   : > { %v494_v33 = vmul.f32 0.01, %v470_v24  ;;  %vm486_vm6 = vcmp.ge.f32.partialorder %v470_v24, 0.0 }
  0xa9   : > { %v502_v39 = vsel %vm486_vm6, %v470_v24, %v494_v33  ;;  %v3056_v24 = vld [vmem:[%s3682_s3 + $0x60] sm:$0xff] }
  0xac   : > { %v471_v10 = vpop.f32.mrf.mxu0 }
  0xad   : > { %v472_v21 = vadd.f32 %v3102_v14, %v471_v10 }
  0xaf   : > { %v495_v30 = vmul.f32 0.01, %v472_v21  ;;  %vm487_vm5 = vcmp.ge.f32.partialorder %v472_v21, 0.0 }
  0xb1   : > { %v503_v37 = vsel %vm487_vm5, %v472_v21, %v495_v30  ;;  %v3051_v21 = vld [vmem:[%s3682_s3 + $0x38] sm:$0xff]  ;;  %v3057_v30 = vld [vmem:[%s3682_s3 + $0x68] sm:$0xff] }
  0xb2   : > { %v3207_v40 = vpack.c.bf16 %v503_v37, %v502_v39  ;;  %v2689_v37 = vld [vmem:[%s3683_s4 + $0x1c] sm:$0xf] }
  0xb4   : > { %v474_v11 = vpop.f32.mrf.mxu0 }
  0xb5   : > { %v475_v18 = vadd.f32 %v3102_v14, %v474_v11 }
  0xb7   : > { %v496_v25 = vmul.f32 0.01, %v475_v18  ;;  %vm488_vm4 = vcmp.ge.f32.partialorder %v475_v18, 0.0 }
  0xb9   : > { %v504_v34 = vsel %vm488_vm4, %v475_v18, %v496_v25  ;;  %v3050_v18 = vld [vmem:[%s3682_s3 + $0x30] sm:$0xff]  ;;  %v3055_v25 = vld [vmem:[%s3682_s3 + $0x58] sm:$0xff] }
  0xbc   : > { %v476_v12 = vpop.f32.mrf.mxu0 }
  0xbd   : > { %v477_v16 = vadd.f32 %v3102_v14, %v476_v12 }
  0xbf   : > { %v497_v22 = vmul.f32 0.01, %v477_v16  ;;  %vm489_vm3 = vcmp.ge.f32.partialorder %v477_v16, 0.0 }
  0xc1   : > { %v505_v31 = vsel %vm489_vm3, %v477_v16, %v497_v22  ;;  %v3054_v22 = vld [vmem:[%s3682_s3 + $0x50] sm:$0xff]  ;;  %vm2527_vm3 = vcmask 3072  }
  0xc2   : > { %v3203_v35 = vpack.c.bf16 %v505_v31, %v504_v34  ;;  %v2671_v31 = vld [vmem:[%s3683_s4 + $0x14] sm:$0xf] }
  0xc3   : > { %v791_v32 = vsel %vm571_vm9, %v2671_v31, 0 }
  0xc4   : > { %v479_v13 = vpop.f32.mrf.mxu0 }
  0xc5   : > { %v480_v15 = vadd.f32 %v3102_v14, %v479_v13 }
  0xc7   : > { %v498_v19 = vmul.f32 0.01, %v480_v15  ;;  %vm490_vm1 = vcmp.ge.f32.partialorder %v480_v15, 0.0 }
  0xc9   : > { %v506_v26 = vsel %vm490_vm1, %v480_v15, %v498_v19  ;;  %v3049_v19 = vld [vmem:[%s3682_s3 + $0x28] sm:$0xff]  ;;  %vm2049_vm1 = vcmask 31744  }
  0xcc   : > { %v481_v17 = vpop.f32.mrf.mxu0 }
  0xcd   : > { %v482_v20 = vadd.f32 %v3102_v14, %v481_v17 }
  0xcf   : > { %vm491_vm2 = vcmp.ge.f32.partialorder %v482_v20, 0.0  ;;  %v499_v23 = vmul.f32 0.01, %v482_v20 }
  0xd1   : > { %v507_v27 = vsel %vm491_vm2, %v482_v20, %v499_v23  ;;  %v3052_v20 = vld [vmem:[%s3682_s3 + $0x40] sm:$0xff]  ;;  %v3053_v23 = vld [vmem:[%s3682_s3 + $0x48] sm:$0xff]  ;;  %vm2111_vm2 = vcmask 261120  }
  0xd2   : > { %v3199_v28 = vpack.c.bf16 %v507_v27, %v506_v26  ;;  %v2680_v26 = vld [vmem:[%s3683_s4 + $0x18] sm:$0xf] }
  0xd3   : > { %v841_v27 = vsel %vm571_vm9, %v2680_v26, 0 }
  0xd4   : > { %527 = vmatpush.bf16.msra.mxu1 %v3199_v28  ;;  %554 = vmatpush.bf16.msra.mxu2 %v3199_v28 }
  0xd5   : > { %850 = vmatpush.bf16.msrb.mxu0 %v841_v27 }
  0xd8   : > { %528 = vmatpush.bf16.msra.mxu1 %v3203_v35  ;;  %555 = vmatpush.bf16.msra.mxu2 %v3203_v35 }
  0xd9   : > { %950 = vmatpush.bf16.msra.mxu0 %v941_v42 }
  0xdc   : > { %529 = vmatpush.bf16.msra.mxu1 %v3207_v40  ;;  %556 = vmatpush.bf16.msra.mxu2 %v3207_v40 }
  0xe0   : > { %530 = vmatpush.bf16.msra.mxu1 %v3214_v44  ;;  %557 = vmatpush.bf16.msra.mxu2 %v3214_v44 }
  0xe3   : > { %2626 = vmatmul.msk.bf16.vlgmr.msra.gmra.mxu1 %vm519_vm10, %v3044_v46  ;;  %2633 = vmatmul.msk.bf16.vlgmr.msra.gmra.mxu2 %vm519_vm10, %v3045_v47 }
  0xe4   : > { %624 = vmatpush.bf16.msrb.mxu1 %v3199_v28  ;;  %650 = vmatpush.bf16.msrb.mxu2 %v641_v45  ;;  %v2707_v45 = vld [vmem:[%s3683_s4 + $0x24] sm:$0xf] }
  0xe8   : > { %724 = vmatpush.bf16.msra.mxu2 %v3199_v28  ;;  %625 = vmatpush.bf16.msrb.mxu1 %v3203_v35 }
  0xec   : > { %725 = vmatpush.bf16.msra.mxu2 %v3203_v35  ;;  %626 = vmatpush.bf16.msrb.mxu1 %v3207_v40 }
  0xf0   : > { %726 = vmatpush.bf16.msra.mxu2 %v3207_v40  ;;  %627 = vmatpush.bf16.msrb.mxu1 %v3214_v44 }
  0xf3   : > { %2643 = vmatmul.msk.bf16.vlgmr.msrb.gmra.mxu1 %vm519_vm10, %v3046_v50  ;;  %v991_v50 = vsel %vm571_vm9, %v2707_v45, 0 }
  0xf4   : > { %700 = vmatpush.bf16.msra.mxu1 %v691_v49  ;;  %727 = vmatpush.bf16.msra.mxu2 %v3214_v44 }
  0xf8   : > { %774 = vmatpush.bf16.msrb.mxu1 %v3199_v28 }
  0xfc   : > { %775 = vmatpush.bf16.msrb.mxu1 %v3203_v35 }
 0x100   : > { %776 = vmatpush.bf16.msrb.mxu1 %v3207_v40 }
 0x104   : > { %777 = vmatpush.bf16.msrb.mxu1 %v3214_v44 }
 0x160   : > { %v532_v55 = vpop.f32.mrf.mxu1 }
 0x166   : > { %v559_v56 = vpop.f32.mrf.mxu2 }
 0x168   : > { %v534_v57 = vpop.f32.mrf.mxu1 }
 0x169   : > { %v537_v0 = vpack.c.bf16 %v534_v57, %v532_v55  ;;  %v2725_v55 = vld [vmem:[%s3683_s4 + $0x2c] sm:$0xf] }
 0x16e   : > { %v561_v58 = vpop.f32.mrf.mxu2 }
 0x16f   : > { %v564_v59 = vpack.c.bf16 %v561_v58, %v559_v56 }
 0x170   : > { %v629_v60 = vpop.f32.mrf.mxu1 }
 0x171   : > { %2635 = vmatmul.msk.bf16.vlgmr.msra.gmra.mxu3 %vm567_vm11, %v564_v59 }
 0x172   : > { %674 = vmatpush.bf16.msra.mxu3 %v3199_v28 }
 0x176   : > { %675 = vmatpush.bf16.msra.mxu3 %v3203_v35 }
 0x178   : > { %v631_v61 = vpop.f32.mrf.mxu1 }
 0x179   : > { %v634_v62 = vpack.c.bf16 %v631_v61, %v629_v60  ;;  %v1091_v60 = vsel %vm571_vm9, %v2725_v55, 0  ;;  %v2734_v61 = vld [vmem:[%s3683_s4 + $0x30] sm:$0xf] }
 0x17a   : > { %676 = vmatpush.bf16.msra.mxu3 %v3207_v40 }
 0x17b   : > { %2645 = vmatmul.msk.bf16.vlgmr.msrb.gmra.mxu2 %vm567_vm11, %v634_v62  ;;  %v1141_v62 = vsel %vm571_vm9, %v2734_v61, 0 }
 0x17c   : > { %800 = vmatpush.bf16.msrb.mxu2 %v791_v32 }
 0x17e   : > { %677 = vmatpush.bf16.msra.mxu3 %v3214_v44 }
 0x181   : > { %2636 = vmatmul.msk.bf16.vlgmr.msrb.gmra.mxu3 %vm567_vm11, %v537_v0 }
 0x182   : > { %750 = vmatpush.bf16.msrb.mxu3 %v741_v1  ;;  %v2743_v1 = vld [vmem:[%s3683_s4 + $0x34] sm:$0xf] }
 0x18b   : > { %2661 = vmatmul.msk.bf16.vlgmr.msra.gmra.mxu2 %vm519_vm10, %v3048_v2 }
 0x191   : > { %2652 = vmatmul.msk.bf16.vlgmr.msra.gmra.mxu3 %vm519_vm10, %v3047_v3 }
 0x192   : > { %824 = vmatpush.bf16.msra.mxu3 %v3199_v28 }
 0x196   : > { %825 = vmatpush.bf16.msra.mxu3 %v3203_v35 }
 0x19a   : > { %826 = vmatpush.bf16.msra.mxu3 %v3207_v40 }
 0x19e   : > { %827 = vmatpush.bf16.msra.mxu3 %v3214_v44 }
 0x1f4   : > { %v584_v4 = vpop.f32.mrf.mxu3 }
 0x1fc   : > { %v3278_v5 = vpop.f32.mrf.mxu3 }
 0x1fe   : > { %v652_v6 = vpop.f32.mrf.mxu2 }
 0x204   : > { %v604_v7 = vpop.f32.mrf.mxu3 }
 0x205   : > { %v605_v8 = vadd.f32 %v604_v7, %v584_v4  ;;  %v1191_v7 = vsel %vm571_vm9, %v2743_v1, 0 }
 0x206   : > { %v3280_v9 = vpop.f32.mrf.mxu2 }
 0x207   : > { %v3282_v10 = vadd.f32 %v652_v6, %v605_v8  ;;  %v2752_v8 = vld [vmem:[%s3683_s4 + $0x38] sm:$0xf] }
 0x20c   : > { %v3284_v11 = vpop.f32.mrf.mxu3 }
 0x20d   : > { %v607_v45 = vadd.f32 %v3284_v11, %v3278_v5 }
 0x20e   : > { %v729_v12 = vpop.f32.mrf.mxu2 }
 0x214   : > { %v679_v13 = vpop.f32.mrf.mxu3 }
 0x216   : > { %v731_v14 = vpop.f32.mrf.mxu2 }
 0x217   : > { %v734_v15 = vpack.c.bf16 %v731_v14, %v729_v12  ;;  %v2761_v14 = vld [vmem:[%s3683_s4 + $0x3c] sm:$0xf] }
 0x219   : > { %2663 = vmatmul.msk.bf16.vlgmr.msrb.gmra.mxu3 %vm567_vm11, %v734_v15 }
 0x21a   : > { %924 = vmatpush.bf16.msrb.mxu3 %v3199_v28 }
 0x21c   : > { %v681_v16 = vpop.f32.mrf.mxu3 }
 0x21d   : > { %v684_v17 = vpack.c.bf16 %v681_v16, %v679_v13 }
 0x21e   : > { %925 = vmatpush.bf16.msrb.mxu3 %v3203_v35 }
 0x21f   : > { %2654 = vmatmul.msk.bf16.vlgmr.msra.gmra.mxu1 %vm567_vm11, %v684_v17 }
 0x220   : > { %874 = vmatpush.bf16.msra.mxu1 %v3199_v28 }
 0x222   : > { %926 = vmatpush.bf16.msrb.mxu3 %v3207_v40 }
 0x224   : > { %875 = vmatpush.bf16.msra.mxu1 %v3203_v35 }
 0x226   : > { %927 = vmatpush.bf16.msrb.mxu3 %v3214_v44 }
 0x228   : > { %876 = vmatpush.bf16.msra.mxu1 %v3207_v40 }
 0x229   : > { %2679 = vmatmul.msk.bf16.vlgmr.msra.gmra.mxu3 %vm519_vm10, %v3050_v18 }
 0x22a   : > { %1024 = vmatpush.bf16.msra.mxu3 %v3199_v28 }
 0x22c   : > { %877 = vmatpush.bf16.msra.mxu1 %v3214_v44 }
 0x22e   : > { %1025 = vmatpush.bf16.msra.mxu3 %v3203_v35 }
 0x22f   : > { %2670 = vmatmul.msk.bf16.vlgmr.msrb.gmra.mxu1 %vm519_vm10, %v3049_v19  ;;  %v1291_v19 = vsel %vm571_vm9, %v2761_v14, 0 }
 0x230   : > { %974 = vmatpush.bf16.msrb.mxu1 %v3199_v28 }
 0x232   : > { %1026 = vmatpush.bf16.msra.mxu3 %v3207_v40 }
 0x234   : > { %975 = vmatpush.bf16.msrb.mxu1 %v3203_v35 }
 0x236   : > { %1027 = vmatpush.bf16.msra.mxu3 %v3214_v44 }
 0x238   : > { %976 = vmatpush.bf16.msrb.mxu1 %v3207_v40 }
 0x239   : > { %2697 = vmatmul.msk.bf16.vlgmr.msrb.gmra.mxu3 %vm519_vm10, %v3052_v20 }
 0x23a   : > { %1124 = vmatpush.bf16.msrb.mxu3 %v3199_v28 }
 0x23c   : > { %977 = vmatpush.bf16.msrb.mxu1 %v3214_v44 }
 0x23e   : > { %1125 = vmatpush.bf16.msrb.mxu3 %v3203_v35 }
 0x23f   : > { %2688 = vmatmul.msk.bf16.vlgmr.msra.gmra.mxu1 %vm519_vm10, %v3051_v21 }
 0x240   : > { %1074 = vmatpush.bf16.msra.mxu1 %v3199_v28 }
 0x242   : > { %1126 = vmatpush.bf16.msrb.mxu3 %v3207_v40 }
 0x244   : > { %1075 = vmatpush.bf16.msra.mxu1 %v3203_v35 }
 0x246   : > { %1127 = vmatpush.bf16.msrb.mxu3 %v3214_v44 }
 0x248   : > { %1076 = vmatpush.bf16.msra.mxu1 %v3207_v40 }
 0x249   : > { %2715 = vmatmul.msk.bf16.vlgmr.msra.gmra.mxu3 %vm519_vm10, %v3054_v22 }
 0x24a   : > { %1224 = vmatpush.bf16.msra.mxu3 %v3199_v28 }
 0x24c   : > { %1077 = vmatpush.bf16.msra.mxu1 %v3214_v44 }
 0x24e   : > { %1225 = vmatpush.bf16.msra.mxu3 %v3203_v35 }
 0x24f   : > { %2706 = vmatmul.msk.bf16.vlgmr.msrb.gmra.mxu1 %vm519_vm10, %v3053_v23 }
 0x250   : > { %1174 = vmatpush.bf16.msrb.mxu1 %v3199_v28 }
 0x252   : > { %1226 = vmatpush.bf16.msra.mxu3 %v3207_v40 }
 0x254   : > { %1175 = vmatpush.bf16.msrb.mxu1 %v3203_v35 }
 0x256   : > { %1227 = vmatpush.bf16.msra.mxu3 %v3214_v44 }
 0x258   : > { %1176 = vmatpush.bf16.msrb.mxu1 %v3207_v40 }
 0x259   : > { %2733 = vmatmul.msk.bf16.vlgmr.msrb.gmra.mxu3 %vm519_vm10, %v3056_v24 }
 0x25c   : > { %1177 = vmatpush.bf16.msrb.mxu1 %v3214_v44 }
 0x25f   : > { %2724 = vmatmul.msk.bf16.vlgmr.msra.gmra.mxu1 %vm519_vm10, %v3055_v25 }
 0x260   : > { %1274 = vmatpush.bf16.msra.mxu1 %v3199_v28  ;;  %v3059_v28 = vld [vmem:[%s3682_s3 + $0x78] sm:$0xff] }
 0x264   : > { %1275 = vmatpush.bf16.msra.mxu1 %v3203_v35 }
 0x268   : > { %1276 = vmatpush.bf16.msra.mxu1 %v3207_v40  ;;  %v891_v40 = vsel %vm571_vm9, %v2689_v37, 0 }
 0x269   : > { %2751 = vmatmul.msk.bf16.vlgmr.msra.gmra.mxu3 %vm519_vm10, %v3058_v29  ;;  %900 = vmatpush.bf16.msra.mxu2 %v891_v40 }
 0x26c   : > { %1277 = vmatpush.bf16.msra.mxu1 %v3214_v44 }
 0x26f   : > { %2742 = vmatmul.msk.bf16.vlgmr.msrb.gmra.mxu1 %vm519_vm10, %v3057_v30 }
 0x27f   : > { %2760 = vmatmul.msk.bf16.vlgmr.msra.gmra.mxu1 %vm519_vm10, %v3059_v28 }
 0x29c   : > { %v702_v33 = vpop.f32.mrf.mxu1  ;;  %v752_v34 = vpop.f32.mrf.mxu3 }
 0x29d   : > { %v707_v35 = vadd.f32 %v702_v33, %v3282_v10  ;;  %v1241_v10 = vsel %vm571_vm9, %v2752_v8, 0  ;;  %v3103_v8 = vld [vmem:[%s3684_s5] ss:$0 sm:$0xff] }
 0x29f   : > { %v3377_v36 = vadd.f32 %v752_v34, %v707_v35 }
 0x2a4   : > { %v3382_v38 = vpop.f32.mrf.mxu1  ;;  %v3384_v39 = vpop.f32.mrf.mxu3 }
 0x2ac   : > { %v779_v43 = vpop.f32.mrf.mxu1  ;;  %v829_v44 = vpop.f32.mrf.mxu3 }
 0x2b4   : > { %v781_v46 = vpop.f32.mrf.mxu1  ;;  %v831_v47 = vpop.f32.mrf.mxu3 }
 0x2b5   : > { %v784_v48 = vpack.c.bf16 %v781_v46, %v779_v43  ;;  %v834_v49 = vpack.c.bf16 %v831_v47, %v829_v44  ;;  %v658_v47 = vadd.f32 %v3280_v9, %v607_v45  ;;  %v2823_v45 = vld [vmem:[%s3685_s6 + $0xe] sm:$0x3] }
 0x2b7   : > { %2672 = vmatmul.msk.bf16.vlgmr.msrb.gmra.mxu2 %vm567_vm11, %v784_v48  ;;  %2681 = vmatmul.msk.bf16.vlgmr.msrb.gmra.mxu0 %vm567_vm11, %v834_v49  ;;  %v708_v48 = vadd.f32 %v3382_v38, %v658_v47  ;;  %v2841_v47 = vld [vmem:[%s3685_s6 + $0x12] sm:$0x3] }
 0x2b8   : > { %1000 = vmatpush.bf16.msrb.mxu2 %v991_v50  ;;  %1050 = vmatpush.bf16.msrb.mxu0 %v1041_v52 }
 0x2b9   : > { %v758_v50 = vadd.f32 %v3384_v39, %v708_v48  ;;  %v2886_v48 = vld [vmem:[%s3685_s6 + $0x1c] sm:$0x3] }
 0x2bc   : > { %v879_v53 = vpop.f32.mrf.mxu1  ;;  %v929_v54 = vpop.f32.mrf.mxu3 }
 0x2c4   : > { %v881_v56 = vpop.f32.mrf.mxu1  ;;  %v931_v57 = vpop.f32.mrf.mxu3 }
 0x2c5   : > { %v884_v58 = vpack.c.bf16 %v881_v56, %v879_v53  ;;  %v934_v59 = vpack.c.bf16 %v931_v57, %v929_v54  ;;  %v3061_v57 = vld [vmem:[%s3686_s7 + $0x8] sm:$0xff] }
 0x2c6   : > { %1381 = vmatpush.bf16.msrb.mxu1 %v3061_v57 }
 0x2c7   : > { %2690 = vmatmul.msk.bf16.vlgmr.msra.gmra.mxu2 %vm567_vm11, %v884_v58  ;;  %2699 = vmatmul.msk.bf16.vlgmr.msra.gmra.mxu0 %vm567_vm11, %v934_v59 }
 0x2c8   : > { %1100 = vmatpush.bf16.msra.mxu2 %v1091_v60  ;;  %1150 = vmatpush.bf16.msra.mxu0 %v1141_v62 }
 0x2cc   : > { %v979_v63 = vpop.f32.mrf.mxu1  ;;  %v1029_v0 = vpop.f32.mrf.mxu3 }
 0x2d4   : > { %v981_v2 = vpop.f32.mrf.mxu1  ;;  %v1031_v3 = vpop.f32.mrf.mxu3 }
 0x2d5   : > { %v984_v4 = vpack.c.bf16 %v981_v2, %v979_v63  ;;  %v1034_v6 = vpack.c.bf16 %v1031_v3, %v1029_v0 }
 0x2d7   : > { %2708 = vmatmul.msk.bf16.vlgmr.msrb.gmra.mxu2 %vm567_vm11, %v984_v4  ;;  %2717 = vmatmul.msk.bf16.vlgmr.msrb.gmra.mxu0 %vm567_vm11, %v1034_v6 }
 0x2d8   : > { %1200 = vmatpush.bf16.msrb.mxu2 %v1191_v7  ;;  %1250 = vmatpush.bf16.msrb.mxu0 %v1241_v10 }
 0x2dc   : > { %v1079_v12 = vpop.f32.mrf.mxu1  ;;  %v1129_v13 = vpop.f32.mrf.mxu3 }
 0x2e4   : > { %v1081_v15 = vpop.f32.mrf.mxu1  ;;  %v1131_v16 = vpop.f32.mrf.mxu3 }
 0x2e5   : > { %v1084_v17 = vpack.c.bf16 %v1081_v15, %v1079_v12  ;;  %v1134_v18 = vpack.c.bf16 %v1131_v16, %v1129_v13 }
 0x2e7   : > { %2726 = vmatmul.msk.bf16.vlgmr.msra.gmra.mxu2 %vm567_vm11, %v1084_v17  ;;  %2735 = vmatmul.msk.bf16.vlgmr.msra.gmra.mxu0 %vm567_vm11, %v1134_v18 }
 0x2e8   : > { %1300 = vmatpush.bf16.msra.mxu2 %v1291_v19 }
 0x2ec   : > { %v1179_v20 = vpop.f32.mrf.mxu1  ;;  %v1229_v21 = vpop.f32.mrf.mxu3 }
 0x2f4   : > { %v1181_v22 = vpop.f32.mrf.mxu1  ;;  %v1231_v23 = vpop.f32.mrf.mxu3 }
 0x2f5   : > { %v1184_v24 = vpack.c.bf16 %v1181_v22, %v1179_v20  ;;  %v1234_v25 = vpack.c.bf16 %v1231_v23, %v1229_v21  ;;  %v1322_v22 = vld [vmem:[%s3685_s6] sm:$0x3]  ;;  %v2764_v23 = vld [vmem:[%s3685_s6 + $0x2] sm:$0x3] }
 0x2f7   : > { %2744 = vmatmul.msk.bf16.vlgmr.msrb.gmra.mxu2 %vm567_vm11, %v1184_v24  ;;  %2753 = vmatmul.msk.bf16.vlgmr.msrb.gmra.mxu0 %vm567_vm11, %v1234_v25  ;;  %v2778_v24 = vld [vmem:[%s3685_s6 + $0x4] sm:$0x3]  ;;  %v2796_v25 = vld [vmem:[%s3685_s6 + $0x8] sm:$0x3] }
 0x2fc   : > { %v1279_v26 = vpop.f32.mrf.mxu1 }
 0x304   : > { %v1281_v27 = vpop.f32.mrf.mxu1 }
 0x305   : > { %v1284_v29 = vpack.c.bf16 %v1281_v27, %v1279_v26  ;;  %v2814_v26 = vld [vmem:[%s3685_s6 + $0xc] sm:$0x3]  ;;  %v2832_v27 = vld [vmem:[%s3685_s6 + $0x10] sm:$0x3] }
 0x307   : > { %2762 = vmatmul.msk.bf16.vlgmr.msra.gmra.mxu2 %vm567_vm11, %v1284_v29  ;;  %v2850_v29 = vld [vmem:[%s3685_s6 + $0x14] sm:$0x3] }
 0x334   : > { %v852_v30 = vpop.f32.mrf.mxu0 }
 0x33a   : > { %v802_v28 = vpop.f32.mrf.mxu2 }
 0x33b   : > { %v807_v31 = vadd.f32 %v802_v28, %v3377_v36  ;;  %v3062_v28 = vld [vmem:[%s3686_s7 + $0x10] sm:$0xff] }
 0x33c   : > { %v854_v32 = vpop.f32.mrf.mxu0 }
 0x33d   : > { %v857_v51 = vadd.f32 %v852_v30, %v807_v31  ;;  %v3060_v30 = vld [vmem:[%s3686_s7] sm:$0xff] }
 0x33e   : > { %1403 = vmatpush.bf16.msrb.mxu2 %v3060_v30 }
 0x342   : > { %v804_v33 = vpop.f32.mrf.mxu2 }
 0x343   : > { %v808_v52 = vadd.f32 %v804_v33, %v758_v50  ;;  %v3063_v50 = vld [vmem:[%s3686_s7 + $0x18] sm:$0xff] }
 0x344   : > { %v952_v34 = vpop.f32.mrf.mxu0  ;;  %1492 = vmatpush.bf16.msra.mxu2 %v3063_v50 }
 0x345   : > { %v858_v54 = vadd.f32 %v854_v32, %v808_v52  ;;  %v3064_v52 = vld [vmem:[%s3686_s7 + $0x20] sm:$0xff] }
 0x34a   : > { %v902_v35 = vpop.f32.mrf.mxu2 }
 0x34b   : > { %v907_v53 = vadd.f32 %v902_v35, %v857_v51  ;;  %v2895_v51 = vld [vmem:[%s3685_s6 + $0x1e] sm:$0x3] }
 0x34c   : > { %v954_v40 = vpop.f32.mrf.mxu0 }
 0x34d   : > { %v957_v55 = vadd.f32 %v952_v34, %v907_v53 }
 0x352   : > { %v904_v37 = vpop.f32.mrf.mxu2 }
 0x353   : > { %v908_v5 = vadd.f32 %v904_v37, %v858_v54 }
 0x354   : > { %v1052_v42 = vpop.f32.mrf.mxu0 }
 0x355   : > { %v958_v9 = vadd.f32 %v954_v40, %v908_v5  ;;  %v2787_v40 = vld [vmem:[%s3685_s6 + $0x6] sm:$0x3]  ;;  %v3066_v5 = vld [vmem:[%s3686_s7 + $0x30] sm:$0xff] }
 0x35a   : > { %v1002_v41 = vpop.f32.mrf.mxu2 }
 0x35b   : > { %v1007_v11 = vadd.f32 %v1002_v41, %v957_v55  ;;  %v3065_v55 = vld [vmem:[%s3686_s7 + $0x28] sm:$0xff] }
 0x35c   : > { %v1054_v44 = vpop.f32.mrf.mxu0 }
 0x35d   : > { %v1057_v38 = vadd.f32 %v1052_v42, %v1007_v11 }
 0x362   : > { %v1004_v43 = vpop.f32.mrf.mxu2 }
 0x363   : > { %v1008_v59 = vadd.f32 %v1004_v43, %v958_v9 }
 0x364   : > { %v1152_v49 = vpop.f32.mrf.mxu0 }
 0x365   : > { %v1058_v39 = vadd.f32 %v1054_v44, %v1008_v59  ;;  %v2805_v44 = vld [vmem:[%s3685_s6 + $0xa] sm:$0x3] }
 0x36a   : > { %v1102_v46 = vpop.f32.mrf.mxu2 }
 0x36b   : > { %v1107_v60 = vadd.f32 %v1102_v46, %v1057_v38  ;;  %v2868_v46 = vld [vmem:[%s3685_s6 + $0x18] sm:$0x3] }
 0x36c   : > { %v1154_v58 = vpop.f32.mrf.mxu0 }
 0x36d   : > { %v1157_v62 = vadd.f32 %v1152_v49, %v1107_v60  ;;  %v2859_v49 = vld [vmem:[%s3685_s6 + $0x16] sm:$0x3] }
 0x372   : > { %v1104_v36 = vpop.f32.mrf.mxu2 }
 0x373   : > { %v1108_v0 = vadd.f32 %v1104_v36, %v1058_v39  ;;  %v2877_v36 = vld [vmem:[%s3685_s6 + $0x1a] sm:$0x3] }
 0x374   : > { %v1252_v63 = vpop.f32.mrf.mxu0  ;;  %v3067_v39 = vld [vmem:[%s3686_s7 + $0x38] sm:$0xff] }
 0x375   : > { %v1158_v3 = vadd.f32 %v1154_v58, %v1108_v0 }
 0x37a   : > { %v1202_v56 = vpop.f32.mrf.mxu2 }
 0x37b   : > { %v1207_v1 = vadd.f32 %v1202_v56, %v1157_v62 }
 0x37c   : > { %v1254_v10 = vpop.f32.mrf.mxu0 }
 0x37d   : > { %v1257_v4 = vadd.f32 %v1252_v63, %v1207_v1 }
 0x382   : > { %v1204_v61 = vpop.f32.mrf.mxu2 }
 0x383   : > { %v1208_v6 = vadd.f32 %v1204_v61, %v1158_v3 }
 0x385   : > { %v1258_v13 = vadd.f32 %v1254_v10, %v1208_v6 }
 0x38a   : > { %v1302_v2 = vpop.f32.mrf.mxu2 }
 0x38b   : > { %v1307_v7 = vadd.f32 %v1302_v2, %v1257_v4  ;;  %v3068_v2 = vld [vmem:[%s3686_s7 + $0x40] sm:$0xff] }
 0x38d   : > { %v1313_v12 = vadd.f32 %v3103_v8, %v1307_v7 }
 0x38f   : > { %v1317_v16 = vmul.f32 0.01, %v1313_v12  ;;  %vm1315_vm12 = vcmp.ge.f32.partialorder %v1313_v12, 0.0 }
 0x391   : > { %v1319_v19 = vsel %vm1315_vm12, %v1313_v12, %v1317_v16  ;;  %v3069_v12 = vld [vmem:[%s3686_s7 + $0x48] sm:$0xff] }
 0x392   : > { %v1304_v14 = vpop.f32.mrf.mxu2 }
 0x393   : > { %v1308_v15 = vadd.f32 %v1304_v14, %v1258_v13  ;;  %v3070_v14 = vld [vmem:[%s3686_s7 + $0x50] sm:$0xff] }
 0x395   : > { %v1314_v17 = vadd.f32 %v3103_v8, %v1308_v15 }
 0x397   : > { %vm1316_vm13 = vcmp.ge.f32.partialorder %v1314_v17, 0.0  ;;  %v1318_v18 = vmul.f32 0.01, %v1314_v17 }
 0x399   : > { %v1320_v20 = vsel %vm1316_vm13, %v1314_v17, %v1318_v18 }
 0x39a   : > { %v1321_v21 = vpack.c.bf16 %v1320_v20, %v1319_v19  ;;  %v3071_v20 = vld [vmem:[%s3686_s7 + $0x58] sm:$0xff] }
 0x39c   : > { %1334 = vmatpush.bf16.msrb.mxu3 %v1321_v21  ;;  %1355 = vmatpush.bf16.msra.mxu0 %v1321_v21 }
 0x39d   : > { %1466 = vmatpush.bf16.msra.mxu1 %v1321_v21 }
 0x39f   : > { %2763 = vmatmul.msk.bf16.vlgmr.msrb.gmra.mxu3 %vm1323_vm14, %v1322_v22  ;;  %2765 = vmatmul.msk.bf16.vlgmr.msra.gmra.mxu0 %vm1323_vm14, %v2764_v23  ;;  %v3072_v22 = vld [vmem:[%s3686_s7 + $0x60] sm:$0xff] }
 0x3a0   : > { %1421 = vmatpush.bf16.msra.mxu3 %v1321_v21  ;;  %1447 = vmatpush.bf16.msrb.mxu0 %v3062_v28  ;;  %v3074_v28 = vld [vmem:[%s3686_s7 + $0x70] sm:$0xff] }
 0x3a4   : > { %1511 = vmatpush.bf16.msrb.mxu3 %v1321_v21  ;;  %1537 = vmatpush.bf16.msra.mxu0 %v3064_v52 }
 0x3af   : > { %2779 = vmatmul.msk.bf16.vlgmr.msra.gmra.mxu3 %vm1323_vm14, %v2778_v24 }
 0x3b0   : > { %1601 = vmatpush.bf16.msra.mxu3 %v1321_v21 }
 0x3bf   : > { %2797 = vmatmul.msk.bf16.vlgmr.msrb.gmra.mxu3 %vm1323_vm14, %v2796_v25 }
 0x3c0   : > { %1691 = vmatpush.bf16.msrb.mxu3 %v1321_v21 }
 0x3cf   : > { %2815 = vmatmul.msk.bf16.vlgmr.msra.gmra.mxu3 %vm1323_vm14, %v2814_v26 }
 0x3d0   : > { %1781 = vmatpush.bf16.msra.mxu3 %v1321_v21 }
 0x3df   : > { %2833 = vmatmul.msk.bf16.vlgmr.msrb.gmra.mxu3 %vm1323_vm14, %v2832_v27 }
 0x3e0   : > { %1871 = vmatpush.bf16.msrb.mxu3 %v1321_v21 }
 0x3ef   : > { %2851 = vmatmul.msk.bf16.vlgmr.msra.gmra.mxu3 %vm1323_vm14, %v2850_v29  ;;  %v3073_v29 = vld [vmem:[%s3686_s7 + $0x68] sm:$0xff] }
 0x3f0   : > { %1961 = vmatpush.bf16.msra.mxu3 %v1321_v21 }
 0x3ff   : > { %2869 = vmatmul.msk.bf16.vlgmr.msrb.gmra.mxu3 %vm1323_vm14, %v2868_v46 }
 0x40f   : > { %2887 = vmatmul.msk.bf16.vlgmr.msra.gmra.mxu3 %vm1323_vm14, %v2886_v48 }
 0x41c   : > { %v1357_v31 = vpop.f32.mrf.mxu0 }
 0x41d   : > { %v1361_v32 = vpack.c.bf16 %v1357_v31, %v1357_v31 }
 0x41f   : > { %2772 = vmatmul.msk.bf16.vlgmr.msrb.gmra.mxu1 %vm1323_vm14, %v1361_v32 }
 0x420   : > { %1556 = vmatpush.bf16.msrb.mxu1 %v1321_v21 }
 0x422   : > { %v1336_v33 = vpop.f32.mrf.mxu3 }
 0x423   : > { %v1340_v34 = vpack.c.bf16 %v1336_v33, %v1336_v33 }
 0x424   : > { %v1359_v35 = vpop.f32.mrf.mxu0 }
 0x425   : > { %2777 = vmatmul.msk.bf16.vlgmr.msrb.gmra.mxu2 %vm1323_vm14, %v1340_v34  ;;  %v3075_v35 = vld [vmem:[%s3686_s7 + $0x78] sm:$0xff] }
 0x426   : > { %1582 = vmatpush.bf16.msrb.mxu2 %v3065_v55 }
 0x42a   : > { %v1338_v37 = vpop.f32.mrf.mxu3 }
 0x42f   : > { %2788 = vmatmul.msk.bf16.vlgmr.msra.gmra.mxu1 %vm1323_vm14, %v2787_v40 }
 0x430   : > { %1646 = vmatpush.bf16.msra.mxu1 %v1321_v21 }
 0x432   : > { %v1423_v41 = vpop.f32.mrf.mxu3 }
 0x433   : > { %v1427_v42 = vpack.c.bf16 %v1423_v41, %v1423_v41 }
 0x435   : > { %2786 = vmatmul.msk.bf16.vlgmr.msrb.gmra.mxu0 %vm1323_vm14, %v1427_v42 }
 0x436   : > { %1627 = vmatpush.bf16.msrb.mxu0 %v3066_v5 }
 0x43a   : > { %v1425_v43 = vpop.f32.mrf.mxu3 }
 0x43f   : > { %2806 = vmatmul.msk.bf16.vlgmr.msrb.gmra.mxu1 %vm1323_vm14, %v2805_v44 }
 0x440   : > { %1736 = vmatpush.bf16.msrb.mxu1 %v1321_v21 }
 0x442   : > { %v1513_v53 = vpop.f32.mrf.mxu3 }
 0x443   : > { %v1517_v54 = vpack.c.bf16 %v1513_v53, %v1513_v53 }
 0x445   : > { %2804 = vmatmul.msk.bf16.vlgmr.msra.gmra.mxu0 %vm1323_vm14, %v1517_v54 }
 0x446   : > { %1717 = vmatpush.bf16.msra.mxu0 %v3068_v2 }
 0x44a   : > { %v1515_v57 = vpop.f32.mrf.mxu3 }
 0x44f   : > { %2824 = vmatmul.msk.bf16.vlgmr.msra.gmra.mxu1 %vm1323_vm14, %v2823_v45 }
 0x450   : > { %1826 = vmatpush.bf16.msra.mxu1 %v1321_v21 }
 0x452   : > { %v1603_v58 = vpop.f32.mrf.mxu3 }
 0x453   : > { %v1607_v9 = vpack.c.bf16 %v1603_v58, %v1603_v58 }
 0x455   : > { %2822 = vmatmul.msk.bf16.vlgmr.msrb.gmra.mxu0 %vm1323_vm14, %v1607_v9 }
 0x456   : > { %1807 = vmatpush.bf16.msrb.mxu0 %v3070_v14 }
 0x45a   : > { %v1605_v61 = vpop.f32.mrf.mxu3 }
 0x45f   : > { %2842 = vmatmul.msk.bf16.vlgmr.msrb.gmra.mxu1 %vm1323_vm14, %v2841_v47 }
 0x460   : > { %1916 = vmatpush.bf16.msrb.mxu1 %v1321_v21 }
 0x462   : > { %v1693_v4 = vpop.f32.mrf.mxu3 }
 0x463   : > { %v1697_v6 = vpack.c.bf16 %v1693_v4, %v1693_v4 }
 0x465   : > { %2840 = vmatmul.msk.bf16.vlgmr.msra.gmra.mxu0 %vm1323_vm14, %v1697_v6 }
 0x466   : > { %1897 = vmatpush.bf16.msra.mxu0 %v3072_v22 }
 0x46a   : > { %v1695_v10 = vpop.f32.mrf.mxu3 }
 0x46f   : > { %2860 = vmatmul.msk.bf16.vlgmr.msra.gmra.mxu1 %vm1323_vm14, %v2859_v49 }
 0x470   : > { %2006 = vmatpush.bf16.msra.mxu1 %v1321_v21 }
 0x472   : > { %v1783_v16 = vpop.f32.mrf.mxu3 }
 0x473   : > { %v1787_v17 = vpack.c.bf16 %v1783_v16, %v1783_v16 }
 0x475   : > { %2858 = vmatmul.msk.bf16.vlgmr.msrb.gmra.mxu0 %vm1323_vm14, %v1787_v17 }
 0x476   : > { %1987 = vmatpush.bf16.msrb.mxu0 %v3074_v28  ;;  %v2929_v28 = vld [vmem:[%s3688_s9 + $0x4] sm:$0x3] }
 0x47a   : > { %v1785_v19 = vpop.f32.mrf.mxu3 }
 0x47b   : > { %v3104_v19 = vld [vmem:[%s3687_s8] ss:$0 sm:$0xff] }
 0x47f   : > { %2878 = vmatmul.msk.bf16.vlgmr.msrb.gmra.mxu1 %vm1323_vm14, %v2877_v36 }
 0x482   : > { %v1873_v24 = vpop.f32.mrf.mxu3 }
 0x483   : > { %v1877_v25 = vpack.c.bf16 %v1873_v24, %v1873_v24 }
 0x485   : > { %2876 = vmatmul.msk.bf16.vlgmr.msra.gmra.mxu0 %vm1323_vm14, %v1877_v25 }
 0x48a   : > { %v1875_v27 = vpop.f32.mrf.mxu3 }
 0x48f   : > { %2896 = vmatmul.msk.bf16.vlgmr.msra.gmra.mxu1 %vm1323_vm14, %v2895_v51 }
 0x492   : > { %v1963_v32 = vpop.f32.mrf.mxu3 }
 0x493   : > { %v1967_v33 = vpack.c.bf16 %v1963_v32, %v1963_v32  ;;  %v3077_v32 = vld [vmem:[%s3689_s10 + $0x8] sm:$0xff] }
 0x495   : > { %2894 = vmatmul.msk.bf16.vlgmr.msrb.gmra.mxu0 %vm1323_vm14, %v1967_v33  ;;  %v3076_v33 = vld [vmem:[%s3689_s10] sm:$0xff] }
 0x49a   : > { %v1965_v37 = vpop.f32.mrf.mxu3 }
 0x49b   : > { %v2989_v37 = vld [vmem:[%s3688_s9 + $0xc] sm:$0x3] }
 0x49c   : > { %v1383_v56 = vpop.f32.mrf.mxu1 }
 0x4a4   : > { %v1385_v11 = vpop.f32.mrf.mxu1 }
 0x4a8   : > { %v1405_v38 = vpop.f32.mrf.mxu2 }
 0x4a9   : > { %v1406_v59 = vadd.f32 %v1405_v38, %v1383_v56 }
 0x4ac   : > { %v1468_v60 = vpop.f32.mrf.mxu1 }
 0x4ad   : > { %v1472_v62 = vpack.c.bf16 %v1468_v60, %v1468_v60 }
 0x4af   : > { %2795 = vmatmul.msk.bf16.vlgmr.msra.gmra.mxu2 %vm1323_vm14, %v1472_v62 }
 0x4b0   : > { %1672 = vmatpush.bf16.msra.mxu2 %v3067_v39  ;;  %v1407_v63 = vpop.f32.mrf.mxu2 }
 0x4b2   : > { %v1449_v0 = vpop.f32.mrf.mxu0 }
 0x4b3   : > { %v3533_v1 = vadd.f32 %v1449_v0, %v1406_v59 }
 0x4b4   : > { %v1470_v3 = vpop.f32.mrf.mxu1 }
 0x4ba   : > { %v1451_v7 = vpop.f32.mrf.mxu0 }
 0x4bc   : > { %v1558_v8 = vpop.f32.mrf.mxu1 }
 0x4bd   : > { %v1562_v13 = vpack.c.bf16 %v1558_v8, %v1558_v8  ;;  %v3079_v8 = vld [vmem:[%s3689_s10 + $0x18] sm:$0xff] }
 0x4be   : > { %2121 = vmatpush.bf16.msrb.mxu1 %v3079_v8 }
 0x4bf   : > { %2813 = vmatmul.msk.bf16.vlgmr.msrb.gmra.mxu2 %vm1323_vm14, %v1562_v13 }
 0x4c0   : > { %1762 = vmatpush.bf16.msrb.mxu2 %v3069_v12  ;;  %v3078_v12 = vld [vmem:[%s3689_s10 + $0x10] sm:$0xff] }
 0x4c2   : > { %v1539_v48 = vpop.f32.mrf.mxu0  ;;  %2122 = vmatpush.bf16.msrb.mxu1 %v3078_v12 }
 0x4c4   : > { %v1560_v15 = vpop.f32.mrf.mxu1 }
 0x4ca   : > { %v1541_v49 = vpop.f32.mrf.mxu0 }
 0x4cc   : > { %v1648_v18 = vpop.f32.mrf.mxu1 }
 0x4cd   : > { %v1652_v21 = vpack.c.bf16 %v1648_v18, %v1648_v18 }
 0x4cf   : > { %2831 = vmatmul.msk.bf16.vlgmr.msra.gmra.mxu2 %vm1323_vm14, %v1652_v21 }
 0x4d0   : > { %1852 = vmatpush.bf16.msra.mxu2 %v3071_v20 }
 0x4d2   : > { %v1629_v36 = vpop.f32.mrf.mxu0 }
 0x4d4   : > { %v1650_v23 = vpop.f32.mrf.mxu1 }
 0x4da   : > { %v1631_v50 = vpop.f32.mrf.mxu0 }
 0x4db   : > { %v2974_v50 = vld [vmem:[%s3688_s9 + $0xa] sm:$0x3] }
 0x4dc   : > { %v1738_v26 = vpop.f32.mrf.mxu1 }
 0x4dd   : > { %v1742_v30 = vpack.c.bf16 %v1738_v26, %v1738_v26 }
 0x4df   : > { %2849 = vmatmul.msk.bf16.vlgmr.msrb.gmra.mxu2 %vm1323_vm14, %v1742_v30  ;;  %v2905_v30 = vld [vmem:[%s3688_s9 + $0x2] sm:$0x3] }
 0x4e0   : > { %1942 = vmatpush.bf16.msrb.mxu2 %v3073_v29  ;;  %v2048_v29 = vld [vmem:[%s3688_s9] sm:$0x3] }
 0x4e2   : > { %v1719_v54 = vpop.f32.mrf.mxu0 }
 0x4e4   : > { %v1740_v31 = vpop.f32.mrf.mxu1 }
 0x4e5   : > { %v2959_v31 = vld [vmem:[%s3688_s9 + $0x8] sm:$0x3] }
 0x4ea   : > { %v1721_v56 = vpop.f32.mrf.mxu0 }
 0x4ec   : > { %v1828_v34 = vpop.f32.mrf.mxu1 }
 0x4ed   : > { %v1832_v40 = vpack.c.bf16 %v1828_v34, %v1828_v34  ;;  %v3081_v34 = vld [vmem:[%s3689_s10 + $0x28] sm:$0xff] }
 0x4ef   : > { %2867 = vmatmul.msk.bf16.vlgmr.msra.gmra.mxu2 %vm1323_vm14, %v1832_v40 }
 0x4f0   : > { %2032 = vmatpush.bf16.msra.mxu2 %v3075_v35  ;;  %v3080_v35 = vld [vmem:[%s3689_s10 + $0x20] sm:$0xff] }
 0x4f2   : > { %v1809_v58 = vpop.f32.mrf.mxu0 }
 0x4f4   : > { %v1830_v41 = vpop.f32.mrf.mxu1 }
 0x4fa   : > { %v1811_v38 = vpop.f32.mrf.mxu0 }
 0x4fb   : > { %v3086_v38 = vld [vmem:[%s3689_s10 + $0x50] sm:$0xff] }
 0x4fc   : > { %v1918_v42 = vpop.f32.mrf.mxu1 }
 0x4fd   : > { %v1922_v43 = vpack.c.bf16 %v1918_v42, %v1918_v42 }
 0x4ff   : > { %2885 = vmatmul.msk.bf16.vlgmr.msrb.gmra.mxu2 %vm1323_vm14, %v1922_v43 }
 0x500   : > { %2149 = vmatpush.bf16.msrb.mxu2 %v3077_v32 }
 0x502   : > { %v1899_v39 = vpop.f32.mrf.mxu0 }
 0x504   : > { %v1920_v44 = vpop.f32.mrf.mxu1  ;;  %2150 = vmatpush.bf16.msrb.mxu2 %v3076_v33 }
 0x50a   : > { %v1901_v63 = vpop.f32.mrf.mxu0 }
 0x50b   : > { %v3093_v63 = vld [vmem:[%s3689_s10 + $0x88] sm:$0xff] }
 0x50c   : > { %v2008_v45 = vpop.f32.mrf.mxu1 }
 0x50d   : > { %v2012_v46 = vpack.c.bf16 %v2008_v45, %v2008_v45  ;;  %v3019_v45 = vld [vmem:[%s3688_s9 + $0x10] sm:$0x3] }
 0x50f   : > { %2903 = vmatmul.msk.bf16.vlgmr.msra.gmra.mxu2 %vm1323_vm14, %v2012_v46 }
 0x514   : > { %v2010_v47 = vpop.f32.mrf.mxu1 }
 0x515   : > { %v2944_v47 = vld [vmem:[%s3688_s9 + $0x6] sm:$0x3] }
 0x532   : > { %v1494_v51 = vpop.f32.mrf.mxu2 }
 0x533   : > { %v1498_v52 = vadd.f32 %v1494_v51, %v3533_v1  ;;  %v1989_v1 = vpop.f32.mrf.mxu0  ;;  %v3004_v51 = vld [vmem:[%s3688_s9 + $0xe] sm:$0x3] }
 0x535   : > { %v1543_v53 = vadd.f32 %v1539_v48, %v1498_v52  ;;  %v3083_v52 = vld [vmem:[%s3689_s10 + $0x38] sm:$0xff] }
 0x536   : > { %2254 = vmatpush.bf16.msra.mxu2 %v3083_v52 }
 0x53a   : > { %v1496_v55 = vpop.f32.mrf.mxu2 }
 0x53b   : > { %v1991_v6 = vpop.f32.mrf.mxu0  ;;  %v3082_v55 = vld [vmem:[%s3689_s10 + $0x30] sm:$0xff] }
 0x53c   : > { %2255 = vmatpush.bf16.msra.mxu2 %v3082_v55  ;;  %v3091_v6 = vld [vmem:[%s3689_s10 + $0x78] sm:$0xff] }
 0x542   : > { %v1584_v57 = vpop.f32.mrf.mxu2 }
 0x543   : > { %v1588_v5 = vadd.f32 %v1584_v57, %v1543_v53  ;;  %v3085_v53 = vld [vmem:[%s3689_s10 + $0x48] sm:$0xff] }
 0x545   : > { %v1633_v11 = vadd.f32 %v1629_v36, %v1588_v5 }
 0x54a   : > { %v1586_v9 = vpop.f32.mrf.mxu2 }
 0x54b   : > { %v3088_v9 = vld [vmem:[%s3689_s10 + $0x60] sm:$0xff] }
 0x552   : > { %v1674_v59 = vpop.f32.mrf.mxu2 }
 0x553   : > { %v1678_v60 = vadd.f32 %v1674_v59, %v1633_v11  ;;  %v3087_v11 = vld [vmem:[%s3689_s10 + $0x58] sm:$0xff] }
 0x555   : > { %v1723_v61 = vadd.f32 %v1719_v54, %v1678_v60  ;;  %v3084_v54 = vld [vmem:[%s3689_s10 + $0x40] sm:$0xff] }
 0x55a   : > { %v1676_v62 = vpop.f32.mrf.mxu2 }
 0x562   : > { %v1764_v0 = vpop.f32.mrf.mxu2 }
 0x563   : > { %v1768_v2 = vadd.f32 %v1764_v0, %v1723_v61 }
 0x565   : > { %v1813_v3 = vadd.f32 %v1809_v58, %v1768_v2  ;;  %v3089_v58 = vld [vmem:[%s3689_s10 + $0x68] sm:$0xff] }
 0x56a   : > { %v1766_v4 = vpop.f32.mrf.mxu2 }
 0x572   : > { %v1854_v7 = vpop.f32.mrf.mxu2 }
 0x573   : > { %v1858_v14 = vadd.f32 %v1854_v7, %v1813_v3  ;;  %v3092_v3 = vld [vmem:[%s3689_s10 + $0x80] sm:$0xff] }
 0x575   : > { %v1903_v16 = vadd.f32 %v1899_v39, %v1858_v14 }
 0x57a   : > { %v1856_v10 = vpop.f32.mrf.mxu2 }
 0x57b   : > { %v3090_v10 = vld [vmem:[%s3689_s10 + $0x70] sm:$0xff] }
 0x582   : > { %v1944_v13 = vpop.f32.mrf.mxu2 }
 0x583   : > { %v1948_v17 = vadd.f32 %v1944_v13, %v1903_v16 }
 0x585   : > { %v1993_v18 = vadd.f32 %v1989_v1, %v1948_v17 }
 0x58a   : > { %v1946_v15 = vpop.f32.mrf.mxu2 }
 0x592   : > { %v2034_v20 = vpop.f32.mrf.mxu2 }
 0x593   : > { %v2038_v21 = vadd.f32 %v2034_v20, %v1993_v18 }
 0x595   : > { %v2043_v22 = vadd.f32 %v3104_v19, %v2038_v21 }
 0x597   : > { %vm2044_vm15 = vcmp.ge.f32.partialorder %v2043_v22, 0.0  ;;  %v2045_v23 = vmul.f32 0.01, %v2043_v22 }
 0x599   : > { %v2046_v24 = vsel %vm2044_vm15, %v2043_v22, %v2045_v23 }
 0x59a   : > { %v2047_v25 = vpack.c.bf16 %v2046_v24, %v2046_v24  ;;  %v2036_v26 = vpop.f32.mrf.mxu2 }
 0x59c   : > { %v2055_v27 = vsel %vm2053_vm0, %v2047_v25, 0 }
 0x59d   : > { %2064 = vmatpush.bf16.msrb.mxu3 %v2055_v27  ;;  %2087 = vmatpush.bf16.msra.mxu0 %v2055_v27 }
 0x59e   : > { %2221 = vmatpush.bf16.msra.mxu1 %v2055_v27 }
 0x5a0   : > { %2904 = vmatmul.msk.bf16.vlgmr.msrb.gmra.mxu3 %vm2049_vm1, %v2048_v29  ;;  %2906 = vmatmul.msk.bf16.vlgmr.msra.gmra.mxu0 %vm2049_vm1, %v2905_v30 }
 0x5a1   : > { %2168 = vmatpush.bf16.msra.mxu3 %v2055_v27  ;;  %2201 = vmatpush.bf16.msrb.mxu0 %v3081_v34 }
 0x5a5   : > { %2274 = vmatpush.bf16.msrb.mxu3 %v2055_v27  ;;  %2202 = vmatpush.bf16.msrb.mxu0 %v3080_v35 }
 0x5a9   : > { %2307 = vmatpush.bf16.msra.mxu0 %v3085_v53 }
 0x5ad   : > { %2308 = vmatpush.bf16.msra.mxu0 %v3084_v54 }
 0x5b0   : > { %2930 = vmatmul.msk.bf16.vlgmr.msra.gmra.mxu3 %vm2049_vm1, %v2929_v28 }
 0x5b1   : > { %2380 = vmatpush.bf16.msra.mxu3 %v2055_v27 }
 0x5c0   : > { %2960 = vmatmul.msk.bf16.vlgmr.msrb.gmra.mxu3 %vm2049_vm1, %v2959_v31 }
 0x5c1   : > { %2486 = vmatpush.bf16.msrb.mxu3 %v2055_v27 }
 0x5d0   : > { %2990 = vmatmul.msk.bf16.vlgmr.msra.gmra.mxu3 %vm2049_vm1, %v2989_v37 }
 0x5e0   : > { %3020 = vmatmul.msk.bf16.vlgmr.msrb.gmra.mxu3 %vm2049_vm1, %v3019_v45 }
 0x61d   : > { %v2089_v40 = vpop.f32.mrf.mxu0 }
 0x61e   : > { %v2093_v41 = vpack.c.bf16 %v2089_v40, %v2089_v40 }
 0x620   : > { %2919 = vmatmul.msk.bf16.vlgmr.msrb.gmra.mxu1 %vm2111_vm2, %v2093_v41 }
 0x621   : > { %2327 = vmatpush.bf16.msrb.mxu1 %v2055_v27 }
 0x623   : > { %v2066_v42 = vpop.f32.mrf.mxu3 }
 0x624   : > { %v2070_v43 = vpack.c.bf16 %v2066_v42, %v2066_v42 }
 0x625   : > { %v2091_v44 = vpop.f32.mrf.mxu0 }
 0x626   : > { %2928 = vmatmul.msk.bf16.vlgmr.msrb.gmra.mxu2 %vm2111_vm2, %v2070_v43 }
 0x627   : > { %2360 = vmatpush.bf16.msrb.mxu2 %v3087_v11 }
 0x62b   : > { %v2068_v46 = vpop.f32.mrf.mxu3  ;;  %2361 = vmatpush.bf16.msrb.mxu2 %v3086_v38 }
 0x630   : > { %2945 = vmatmul.msk.bf16.vlgmr.msra.gmra.mxu1 %vm2049_vm1, %v2944_v47 }
 0x631   : > { %2433 = vmatpush.bf16.msra.mxu1 %v2055_v27 }
 0x633   : > { %v2170_v48 = vpop.f32.mrf.mxu3 }
 0x634   : > { %v2174_v49 = vpack.c.bf16 %v2170_v48, %v2170_v48 }
 0x636   : > { %2943 = vmatmul.msk.bf16.vlgmr.msrb.gmra.mxu0 %vm2111_vm2, %v2174_v49 }
 0x637   : > { %2413 = vmatpush.bf16.msrb.mxu0 %v3089_v58 }
 0x63b   : > { %v2172_v36 = vpop.f32.mrf.mxu3  ;;  %2414 = vmatpush.bf16.msrb.mxu0 %v3088_v9 }
 0x640   : > { %2975 = vmatmul.msk.bf16.vlgmr.msrb.gmra.mxu1 %vm2049_vm1, %v2974_v50 }
 0x643   : > { %v2276_v56 = vpop.f32.mrf.mxu3 }
 0x644   : > { %v2280_v57 = vpack.c.bf16 %v2276_v56, %v2276_v56 }
 0x646   : > { %2973 = vmatmul.msk.bf16.vlgmr.msra.gmra.mxu0 %vm2111_vm2, %v2280_v57 }
 0x647   : > { %2519 = vmatpush.bf16.msra.mxu0 %v3093_v63 }
 0x64b   : > { %v2278_v5 = vpop.f32.mrf.mxu3  ;;  %2520 = vmatpush.bf16.msra.mxu0 %v3092_v3 }
 0x650   : > { %3005 = vmatmul.msk.bf16.vlgmr.msra.gmra.mxu1 %vm2049_vm1, %v3004_v51 }
 0x653   : > { %v2382_v59 = vpop.f32.mrf.mxu3 }
 0x654   : > { %v2386_v61 = vpack.c.bf16 %v2382_v59, %v2382_v59 }
 0x656   : > { %3003 = vmatmul.msk.bf16.vlgmr.msrb.gmra.mxu0 %vm2111_vm2, %v2386_v61 }
 0x65b   : > { %v2384_v39 = vpop.f32.mrf.mxu3 }
 0x663   : > { %v2488_v1 = vpop.f32.mrf.mxu3 }
 0x664   : > { %v2492_v7 = vpack.c.bf16 %v2488_v1, %v2488_v1 }
 0x666   : > { %3033 = vmatmul.msk.bf16.vlgmr.msra.gmra.mxu0 %vm2111_vm2, %v2492_v7 }
 0x66b   : > { %v2490_v15 = vpop.f32.mrf.mxu3 }
 0x69d   : > { %v2124_v60 = vpop.f32.mrf.mxu1 }
 0x6a5   : > { %v2126_v62 = vpop.f32.mrf.mxu1 }
 0x6a9   : > { %v2152_v0 = vpop.f32.mrf.mxu2 }
 0x6aa   : > { %v2153_v2 = vadd.f32 %v2152_v0, %v2124_v60 }
 0x6ad   : > { %v2223_v4 = vpop.f32.mrf.mxu1 }
 0x6ae   : > { %v2227_v8 = vpack.c.bf16 %v2223_v4, %v2223_v4 }
 0x6b0   : > { %2958 = vmatmul.msk.bf16.vlgmr.msra.gmra.mxu2 %vm2111_vm2, %v2227_v8 }
 0x6b1   : > { %2466 = vmatpush.bf16.msra.mxu2 %v3091_v6  ;;  %v2154_v12 = vpop.f32.mrf.mxu2 }
 0x6b3   : > { %v2204_v13 = vpop.f32.mrf.mxu0 }
 0x6b4   : > { %v2208_v14 = vadd.f32 %v2204_v13, %v2153_v2 }
 0x6b5   : > { %v2225_v16 = vpop.f32.mrf.mxu1  ;;  %2467 = vmatpush.bf16.msra.mxu2 %v3090_v10 }
 0x6bb   : > { %v2206_v17 = vpop.f32.mrf.mxu0 }
 0x6bd   : > { %v2329_v18 = vpop.f32.mrf.mxu1 }
 0x6be   : > { %v2333_v19 = vpack.c.bf16 %v2329_v18, %v2329_v18 }
 0x6c0   : > { %2988 = vmatmul.msk.bf16.vlgmr.msrb.gmra.mxu2 %vm2111_vm2, %v2333_v19 }
 0x6c3   : > { %v2310_v24 = vpop.f32.mrf.mxu0 }
 0x6c5   : > { %v2331_v20 = vpop.f32.mrf.mxu1 }
 0x6cb   : > { %v2312_v25 = vpop.f32.mrf.mxu0 }
 0x6cd   : > { %v2435_v21 = vpop.f32.mrf.mxu1 }
 0x6ce   : > { %v2439_v22 = vpack.c.bf16 %v2435_v21, %v2435_v21 }
 0x6d0   : > { %3018 = vmatmul.msk.bf16.vlgmr.msra.gmra.mxu2 %vm2111_vm2, %v2439_v22 }
 0x6d3   : > { %v2416_v26 = vpop.f32.mrf.mxu0 }
 0x6d5   : > { %v2437_v23 = vpop.f32.mrf.mxu1 }
 0x6db   : > { %v2418_v27 = vpop.f32.mrf.mxu0 }
 0x6e3   : > { %v2522_v29 = vpop.f32.mrf.mxu0 }
 0x6eb   : > { %v2524_v31 = vpop.f32.mrf.mxu0 }
 0x733   : > { %v2257_v30 = vpop.f32.mrf.mxu2 }
 0x734   : > { %v2261_v28 = vadd.f32 %v2257_v30, %v2208_v14 }
 0x736   : > { %v2314_v32 = vadd.f32 %v2310_v24, %v2261_v28 }
 0x73b   : > { %v2259_v33 = vpop.f32.mrf.mxu2 }
 0x743   : > { %v2363_v34 = vpop.f32.mrf.mxu2 }
 0x744   : > { %v2367_v37 = vadd.f32 %v2363_v34, %v2314_v32 }
 0x746   : > { %v2420_v40 = vadd.f32 %v2416_v26, %v2367_v37 }
 0x74b   : > { %v2365_v35 = vpop.f32.mrf.mxu2 }
 0x753   : > { %v2469_v41 = vpop.f32.mrf.mxu2 }
 0x754   : > { %v2473_v42 = vadd.f32 %v2469_v41, %v2420_v40 }
 0x756   : > { %v2526_v43 = vadd.f32 %v2522_v29, %v2473_v42 }
 0x758   : > { %2528 = vst.msk [vmem:[%s384_s14] sm:$0xf] %vm2527_vm3, %v2526_v43 }
 0x75b   : > { %v2471_v44 = vpop.f32.mrf.mxu2 }
 0x75c PF: > { %s21_s17 = sadd.s32 1, %s3111_s17  }
 0x75d   : > { %p18_p4 = scmp.ge.s32.totalorder %s21_s17, 4  }
 0x75f   :  { %20 = sbr.rel (!%p18_p4) target bundleno = 1 (0x1), region = 170 }

</bundles_post_ra>
